<compile_context>
chip_gen: v7x
topology: tpu7x:2x2x1
jax: 0.10.0
libtpu: 0.0.40
codegen_flags: <defaults>
</compile_context>

<pallas_src>
import functools

import jax
import jax.numpy as jnp
from jax.experimental import pallas as pl
from jax.experimental.pallas import tpu as pltpu

_LANE = 128


def _round_up(n, m):
    return ((n + m - 1) // m) * m


def _pad_to(a, shape):
    pads = [(0, t - s) for s, t in zip(a.shape, shape)]
    if all(p == (0, 0) for p in pads):
        return a
    return jnp.pad(a, pads)


def _derive_encoder_config(C, L, Hp, Fp):
    """Per-generation sample tile `tb` + scoped-VMEM limit (v5e/v6e 128 MiB, v7x 64 MiB)."""
    try:
        vmem_cap = int(pltpu.get_tpu_info().vmem_capacity_bytes)
    except Exception:
        vmem_cap = 64 * 1024 * 1024          # conservative fallback: v7x per-core VMEM
    vmem_limit = min(vmem_cap * 3 // 4, 100 * 1024 * 1024)

    cp8 = _round_up(C, 8)
    lp128 = _round_up(L, _LANE)
    k3p = _round_up(3 * C, _LANE)
    # Approximate per-sample VMEM working set of one grid step (bytes, layout-padded).
    per_sample = (
        2 * cp8 * lp128 * 4                        # double-buffered raw input block (f32)
        + 2 * _round_up(L + 2, 8) * _LANE * 4      # in-kernel channels-last copy + halo
        + L * k3p * (4 + 2)                        # im2col LHS (f32 temp + bf16 operand)
        + L * Hp * 4                               # conv activations h (f32) -- scaling term
        + Hp * 4 + 2 * 2 * Fp                      # pooled + double-buffered bf16 output
    )
    weights = 2 * ((3 * C * Hp + Hp * Fp) * 2 + (Hp + Fp) * 4)
    budget = vmem_limit // 2 - weights             # headroom for compiler scratch / spills
    tb = budget // max(per_sample, 1)
    tb = int(min(512, max(8, (tb // 8) * 8)))
    return tb, int(vmem_limit)


# ----------------------------------------------------------------------------
# Kernel 1: CNN1D embedding (in-VMEM im2col, single K=3C matmul, pool, linear)
# ----------------------------------------------------------------------------
def _encoder_kernel(x_ref, w1_ref, b1_ref, w2_ref, b2_ref, o_ref):
    # x_ref : (tb, C, L)   f32  raw activations (no wrapper re-layout / cast / pad)
    # w1_ref: (3*C, Hp)    bf16 conv taps stacked tap-major along the contraction dim
    # b1_ref: (1, Hp)      f32
    # w2_ref: (Hp, Fp)     bf16 linear head, pre-scaled by 1/L (mean pool folded in)
    # b2_ref: (1, Fp)      f32
    # o_ref : (tb, Fp)     bf16 lane-dense features
    x = x_ref[...]
    tb, c, l = x.shape
    hp = w1_ref.shape[-1]

    # In-VMEM re-layout to channels-last + conv pad=1 halo.  The transpose / halo
    # concat / shifted slices act on the tiny (tb, L, C) raw input (C ~ 4), not on
    # the (tb*L, Hp) activations, so their copy cost is negligible.
    xt = jnp.transpose(x, (0, 2, 1))                        # (tb, L, C)
    zrow = jnp.zeros((tb, 1, c), x.dtype)
    xpad = jnp.concatenate([zrow, xt, zrow], axis=1)        # (tb, L+2, C)
    lhs = jnp.concatenate(
        [xpad[:, 0:l, :], xpad[:, 1:l + 1, :], xpad[:, 2:l + 2, :]], axis=2)
    lhs = lhs.astype(jnp.bfloat16).reshape(tb * l, 3 * c)   # (tb*L, 3C) im2col

    # Single K=3C MXU matmul (f32 accumulation), bias + ReLU on the VPU.
    h = jnp.dot(lhs, w1_ref[...], preferred_element_type=jnp.float32)   # (tb*L, Hp)
    h = jnp.maximum(h + b1_ref[...], 0.0)

    # Global mean pool over L (1/L folded into w2) and the linear head.
    pooled = jnp.sum(h.reshape(tb, l, hp), axis=1)          # (tb, Hp) f32
    feat = jnp.dot(pooled.astype(jnp.bfloat16), w2_ref[...],
                   preferred_element_type=jnp.float32) + b2_ref[...]
    o_ref[...] = feat.astype(o_ref.dtype)


def encode(x, w1p, b1p, w2p, b2p, *, tb, vmem_limit):
    """x: [N, C, L] f32 (raw layout) -> features [N, Fp] bf16."""
    N, C, L = x.shape
    K3, Hp = w1p.shape
    Fp = w2p.shape[-1]
    tb = max(1, min(tb, N))

    flops = 2 * N * L * K3 * Hp + 2 * N * Hp * Fp
    bytes_accessed = N * C * L * 4 + N * Fp * 2 + (K3 * Hp + Hp * Fp) * 2 + (Hp + Fp) * 4

    return pl.pallas_call(
        _encoder_kernel,
        out_shape=jax.ShapeDtypeStruct((N, Fp), jnp.bfloat16),
        grid=(pl.cdiv(N, tb),),
        in_specs=[
            pl.BlockSpec((tb, C, L), lambda i: (i, 0, 0)),
            pl.BlockSpec((K3, Hp), lambda i: (0, 0)),
            pl.BlockSpec((1, Hp), lambda i: (0, 0)),
            pl.BlockSpec((Hp, Fp), lambda i: (0, 0)),
            pl.BlockSpec((1, Fp), lambda i: (0, 0)),
        ],
        out_specs=pl.BlockSpec((tb, Fp), lambda i: (i, 0)),
        compiler_params=pltpu.CompilerParams(
            dimension_semantics=("parallel",),           # megacore split on v7x
            vmem_limit_bytes=vmem_limit,
        ),
        cost_estimate=pl.CostEstimate(
            flops=flops, transcendentals=0, bytes_accessed=bytes_accessed),
    )(x, w1p, b1p, w2p, b2p)


# ----------------------------------------------------------------------------
# Kernel 2: prototypes (averaging matmul) + euclidean distances, gridded over B
# ----------------------------------------------------------------------------
def _proto_dist_kernel(sup_ref, avg_ref, qry_ref, o_ref):
    # sup_ref: (bt, S, Fp)  bf16
    # avg_ref: (bt, Wp, S)  f32   one-hot already divided by class counts (zero rows
    #                             for the lane-padding classes)
    # qry_ref: (bt, Q, Fp)  bf16
    # o_ref  : (bt, Q, Wp)  f32   logits = -euclidean distance (lane-dense Wp)
    sup = sup_ref[...].astype(jnp.float32)
    qry = qry_ref[...].astype(jnp.float32)
    avg = avg_ref[...]

    protos = jnp.einsum('bws,bsf->bwf', avg, sup,
                        preferred_element_type=jnp.float32)             # (bt, Wp, Fp)
    # Cross term in bf16 on the MXU (f32 accumulation); norms stay in f32.
    cross = jnp.einsum('bqf,bwf->bqw', qry_ref[...], protos.astype(jnp.bfloat16),
                       preferred_element_type=jnp.float32)              # (bt, Q, Wp)
    qn = jnp.sum(qry * qry, axis=-1, keepdims=True)                     # (bt, Q, 1)
    pn = jnp.sum(protos * protos, axis=-1)                              # (bt, Wp)
    d2 = jnp.maximum(qn + pn[:, None, :] - 2.0 * cross, 0.0)
    o_ref[...] = -jnp.sqrt(d2)


def proto_logits(sup_feat, avg_mat, qry_feat, *, vmem_limit, bt=1):
    """[B,S,Fp] bf16, [B,Wp,S] f32, [B,Q,Fp] bf16 -> logits [B,Q,Wp] f32."""
    B, S, Fp = sup_feat.shape
    Q = qry_feat.shape[1]
    Wp = avg_mat.shape[1]
    bt = max(1, min(bt, B))

    flops = 2 * B * (Wp * S * Fp + Q * Wp * Fp)
    bytes_accessed = B * ((S + Q) * Fp * 2 + Wp * S * 4 + Q * Wp * 4)

    return pl.pallas_call(
        _proto_dist_kernel,
        out_shape=jax.ShapeDtypeStruct((B, Q, Wp), jnp.float32),
        grid=(pl.cdiv(B, bt),),
        in_specs=[
            pl.BlockSpec((bt, S, Fp), lambda i: (i, 0, 0)),
            pl.BlockSpec((bt, Wp, S), lambda i: (i, 0, 0)),
            pl.BlockSpec((bt, Q, Fp), lambda i: (i, 0, 0)),
        ],
        out_specs=pl.BlockSpec((bt, Q, Wp), lambda i: (i, 0, 0)),
        compiler_params=pltpu.CompilerParams(
            dimension_semantics=("parallel",),
            vmem_limit_bytes=vmem_limit,
        ),
        cost_estimate=pl.CostEstimate(
            flops=flops, transcendentals=0, bytes_accessed=bytes_accessed),
    )(sup_feat, avg_mat, qry_feat)


# ----------------------------------------------------------------------------
# Glue: parameter init, full forward, pure-JAX reference
# ----------------------------------------------------------------------------
def init_params(key, in_channels, hidden_dim, feature_dim):
    k1, k2, k3, k4 = jax.random.split(key, 4)
    K = 3 * in_channels
    w1 = jax.random.normal(k1, (3, in_channels, hidden_dim), jnp.float32) * (1.0 / jnp.sqrt(K))
    b1 = jax.random.normal(k2, (hidden_dim,), jnp.float32) * 0.01
    w2 = jax.random.normal(k3, (hidden_dim, feature_dim), jnp.float32) * (1.0 / jnp.sqrt(hidden_dim))
    b2 = jax.random.normal(k4, (feature_dim,), jnp.float32) * 0.01
    return w1, b1, w2, b2


@functools.partial(jax.jit, static_argnames=("n_way", "tb", "vmem_limit"))
def _forward_impl(params, support_images, support_labels, query_images, *,
                  n_way, tb, vmem_limit):
    w1, b1, w2, b2 = params
    B, S, C, L = support_images.shape
    Q = query_images.shape[1]
    H = w1.shape[-1]
    F = w2.shape[-1]
    Hp = _round_up(H, _LANE)
    Fp = _round_up(F, _LANE)
    Wp = _round_up(n_way, _LANE)

    # Lane-dense zero-padded weights (padded feature columns are identically zero and
    # cancel in the euclidean distance).  Conv taps stacked tap-major along K=3C and
    # the 1/L of the global mean pool folded into w2.  Tiny one-off ops.
    w1p = _pad_to(w1.reshape(3 * C, H), (3 * C, Hp)).astype(jnp.bfloat16)
    b1p = _pad_to(b1.reshape(1, H), (1, Hp)).astype(jnp.float32)
    w2p = (_pad_to(w2, (Hp, Fp)) * (1.0 / L)).astype(jnp.bfloat16)
    b2p = _pad_to(b2.reshape(1, F), (1, Fp)).astype(jnp.float32)

    # Encoder runs straight on the raw [N, C, L] layout (reshape of contiguous data is
    # free): no wrapper transpose / halo-pad / dtype-cast HBM passes.
    sup_feat = encode(support_images.reshape(B * S, C, L), w1p, b1p, w2p, b2p,
                      tb=tb, vmem_limit=vmem_limit).reshape(B, S, Fp)
    qry_feat = encode(query_images.reshape(B * Q, C, L), w1p, b1p, w2p, b2p,
                      tb=tb, vmem_limit=vmem_limit).reshape(B, Q, Fp)

    # Normalized class-averaging matrix, lane-padded to Wp (zero rows -> zero
    # prototypes for the padded classes, sliced off below).
    onehot = jax.nn.one_hot(support_labels, Wp, dtype=jnp.float32)       # (B, S, Wp)
    counts = jnp.maximum(jnp.sum(onehot, axis=1), 1.0)                   # empty-class guard
    avg = jnp.swapaxes(onehot, 1, 2) / counts[:, :, None]                # (B, Wp, S)

    logits = proto_logits(sup_feat, avg, qry_feat, vmem_limit=vmem_limit)  # (B, Q, Wp)
    return logits[..., :n_way]


def protonet_forward(params, support_images, support_labels, query_images, *,
                     n_way, tb=None):
    """support_images: [B, n_support, C, L], support_labels: [B, n_support] int32,
    query_images: [B, n_query, C, L] -> logits [B, n_query, n_way]."""
    _, _, C, L = support_images.shape
    Hp = _round_up(params[0].shape[-1], _LANE)
    Fp = _round_up(params[2].shape[-1], _LANE)
    auto_tb, vmem_limit = _derive_encoder_config(C, L, Hp, Fp)
    if tb is None:
        tb = auto_tb
    return _forward_impl(params, support_images, support_labels, query_images,
                         n_way=int(n_way), tb=int(tb), vmem_limit=int(vmem_limit))


def reference_forward(params, support_images, support_labels, query_images, n_way):
    """Pure-JAX f32 reference with identical semantics (sanity check)."""
    w1, b1, w2, b2 = params

    def enc(images):
        Bn = images.shape[0] * images.shape[1]
        C, L = images.shape[2], images.shape[3]
        x = images.reshape(Bn, C, L).transpose(0, 2, 1)
        xp = jnp.pad(x, ((0, 0), (1, 1), (0, 0)))
        h = jnp.zeros((Bn, L, w1.shape[-1]), jnp.float32) + b1
        for t in range(3):
            h = h + jnp.einsum('nlc,ch->nlh', xp[:, t:t + L, :], w1[t])
        h = jnp.maximum(h, 0.0)
        pooled = jnp.mean(h, axis=1)
        return pooled @ w2 + b2

    B, S = support_images.shape[:2]
    Q = query_images.shape[1]
    sf = enc(support_images).reshape(B, S, -1)
    qf = enc(query_images).reshape(B, Q, -1)
    oh = jax.nn.one_hot(support_labels, n_way, dtype=jnp.float32)
    counts = jnp.maximum(jnp.sum(oh, axis=1), 1.0)
    protos = jnp.einsum('bsw,bsf->bwf', oh, sf) / counts[:, :, None]
    d2 = jnp.sum((qf[:, :, None, :] - protos[:, None, :, :]) ** 2, axis=-1)
    return -jnp.sqrt(jnp.maximum(d2, 0.0))


if __name__ == "__main__":
    # small episode: 2 tasks, 4-way 2-shot, 2 queries per class, C=4, L=16
    batch_size, n_way, n_shot, n_qpc = 2, 4, 2, 2
    in_channels, length = 4, 16
    hidden_dim, feature_dim = 32, 32
    n_support, n_query = n_way * n_shot, n_way * n_qpc

    key = jax.random.PRNGKey(0)
    k_par, k_sup, k_qry = jax.random.split(key, 3)

    params = init_params(k_par, in_channels, hidden_dim, feature_dim)
    support_images = jax.random.normal(
        k_sup, (batch_size, n_support, in_channels, length), jnp.float32)
    query_images = jax.random.normal(
        k_qry, (batch_size, n_query, in_channels, length), jnp.float32)
    support_labels = jnp.tile(
        jnp.repeat(jnp.arange(n_way, dtype=jnp.int32), n_shot)[None, :], (batch_size, 1))

    logits = protonet_forward(params, support_images, support_labels, query_images,
                              n_way=n_way)
    logits = jax.block_until_ready(logits)

    assert logits.shape == (batch_size, n_query, n_way)
    assert bool(jnp.all(jnp.isfinite(logits)))

    ref = reference_forward(params, support_images, support_labels, query_images, n_way)
    max_err = float(jnp.max(jnp.abs(logits - ref)))
    # loose tolerance: bf16 matmul operands + bf16 feature storage vs. f32 reference
    assert max_err < 0.35, f"mismatch vs reference: {max_err}"
    print("KERNEL_OK")
</pallas_src>

<mosaic_0001>
module attributes {stable_mosaic.version = 11 : i64} {
  func.func @_proto_dist_kernel(%arg0: i32, %arg1: memref<1x8x128xbf16, #tpu.memory_space<vmem>>, %arg2: memref<1x128x8xf32, #tpu.memory_space<vmem>>, %arg3: memref<1x8x128xbf16, #tpu.memory_space<vmem>>, %arg4: memref<1x8x128xf32, #tpu.memory_space<vmem>>) attributes {dimension_semantics = [#tpu.dimension_semantics<parallel>], iteration_bounds = array<i64: 2>, scalar_prefetch = 0 : i64, scratch_operands = 0 : i64, tpu.core_type = #tpu.core_type<tc>, window_params = [{transform_indices = @transform_0, window_bounds = array<i64: 1, 8, 128>}, {transform_indices = @transform_1, window_bounds = array<i64: 1, 128, 8>}, {transform_indices = @transform_2, window_bounds = array<i64: 1, 8, 128>}, {transform_indices = @transform_3, window_bounds = array<i64: 1, 8, 128>}]} {
    %c0 = arith.constant 0 : index
    %c0_0 = arith.constant 0 : index
    %c0_1 = arith.constant 0 : index
    %0 = vector.load %arg1[%c0, %c0_0, %c0_1] : memref<1x8x128xbf16, #tpu.memory_space<vmem>>, vector<1x8x128xbf16>
    %1 = arith.extf %0 : vector<1x8x128xbf16> to vector<1x8x128xf32>
    %c0_2 = arith.constant 0 : index
    %c0_3 = arith.constant 0 : index
    %c0_4 = arith.constant 0 : index
    %2 = vector.load %arg3[%c0_2, %c0_3, %c0_4] : memref<1x8x128xbf16, #tpu.memory_space<vmem>>, vector<1x8x128xbf16>
    %3 = arith.extf %2 : vector<1x8x128xbf16> to vector<1x8x128xf32>
    %c0_5 = arith.constant 0 : index
    %c0_6 = arith.constant 0 : index
    %c0_7 = arith.constant 0 : index
    %4 = vector.load %arg2[%c0_5, %c0_6, %c0_7] : memref<1x128x8xf32, #tpu.memory_space<vmem>>, vector<1x128x8xf32>
    "tpu.trace_start"() <{level = 10 : i32, message = "bws,bsf->bwf"}> : () -> ()
    %cst = arith.constant dense<0.000000e+00> : vector<1x128x128xf32>
    %5 = tpu.matmul %4, %1, %cst {dimension_numbers = #tpu.dot_dimension_numbers<[2], [1], [1], [2], [0, 0, 0, 1, 1, 2], [0], [0]>} : vector<1x128x8xf32>, vector<1x8x128xf32>, vector<1x128x128xf32> -> vector<1x128x128xf32>
    "tpu.trace_stop"() : () -> ()
    %c0_8 = arith.constant 0 : index
    %c0_9 = arith.constant 0 : index
    %c0_10 = arith.constant 0 : index
    %6 = vector.load %arg3[%c0_8, %c0_9, %c0_10] : memref<1x8x128xbf16, #tpu.memory_space<vmem>>, vector<1x8x128xbf16>
    %7 = arith.truncf %5 : vector<1x128x128xf32> to vector<1x128x128xbf16>
    "tpu.trace_start"() <{level = 10 : i32, message = "bqf,bwf->bqw"}> : () -> ()
    %cst_11 = arith.constant dense<0.000000e+00> : vector<1x8x128xf32>
    %8 = tpu.matmul %6, %7, %cst_11 {dimension_numbers = #tpu.dot_dimension_numbers<[2], [2], [1], [1], [0, 0, 0, 1, 1, 1], [0], [0]>} : vector<1x8x128xbf16>, vector<1x128x128xbf16>, vector<1x8x128xf32> -> vector<1x8x128xf32>
    "tpu.trace_stop"() : () -> ()
    %9 = arith.mulf %3, %3 : vector<1x8x128xf32>
    %cst_12 = arith.constant dense<0.000000e+00> : vector<1x8xf32>
    %10 = vector.multi_reduction <add>, %9, %cst_12 [2] : vector<1x8x128xf32> to vector<1x8xf32>
    %11 = vector.shape_cast %10 : vector<1x8xf32> to vector<1x8x1xf32>
    %12 = arith.mulf %5, %5 : vector<1x128x128xf32>
    %cst_13 = arith.constant dense<0.000000e+00> : vector<1x128xf32>
    %13 = vector.multi_reduction <add>, %12, %cst_13 [2] : vector<1x128x128xf32> to vector<1x128xf32>
    %14 = vector.shape_cast %13 : vector<1x128xf32> to vector<1x1x128xf32>
    %15 = vector.broadcast %11 : vector<1x8x1xf32> to vector<1x8x128xf32>
    %16 = vector.broadcast %14 : vector<1x1x128xf32> to vector<1x8x128xf32>
    %17 = arith.addf %15, %16 : vector<1x8x128xf32>
    %cst_14 = arith.constant 2.000000e+00 : f32
    %18 = vector.broadcast %cst_14 : f32 to vector<1x8x128xf32>
    %19 = arith.mulf %18, %8 : vector<1x8x128xf32>
    %20 = arith.subf %17, %19 : vector<1x8x128xf32>
    %cst_15 = arith.constant 0.000000e+00 : f32
    %21 = vector.broadcast %cst_15 : f32 to vector<1x8x128xf32>
    %22 = arith.maximumf %20, %21 : vector<1x8x128xf32>
    %23 = math.sqrt %22 : vector<1x8x128xf32>
    %cst_16 = arith.constant 0.000000e+00 : f32
    %24 = vector.broadcast %cst_16 : f32 to vector<1x8x128xf32>
    %25 = arith.subf %24, %23 : vector<1x8x128xf32>
    %c0_17 = arith.constant 0 : index
    %c0_18 = arith.constant 0 : index
    %c0_19 = arith.constant 0 : index
    %26 = vector.load %arg4[%c0_17, %c0_18, %c0_19] : memref<1x8x128xf32, #tpu.memory_space<vmem>>, vector<1x8x128xf32>
    tpu.vector_store %arg4[%c0_17, %c0_18, %c0_19], %25 {strides = array<i32>} : memref<1x8x128xf32, #tpu.memory_space<vmem>>, vector<1x8x128xf32>,
    return
  }
  func.func @transform_0(%arg0: i32) -> (i32, i32, i32) {
    %c0_i32 = arith.constant 0 : i32
    %c0_i32_0 = arith.constant 0 : i32
    %c0_i32_1 = arith.constant 0 : i32
    return %arg0, %c0_i32, %c0_i32_0 : i32, i32, i32
  }
  func.func @transform_1(%arg0: i32) -> (i32, i32, i32) {
    %c0_i32 = arith.constant 0 : i32
    %c0_i32_0 = arith.constant 0 : i32
    %c0_i32_1 = arith.constant 0 : i32
    return %arg0, %c0_i32, %c0_i32_0 : i32, i32, i32
  }
  func.func @transform_2(%arg0: i32) -> (i32, i32, i32) {
    %c0_i32 = arith.constant 0 : i32
    %c0_i32_0 = arith.constant 0 : i32
    %c0_i32_1 = arith.constant 0 : i32
    return %arg0, %c0_i32, %c0_i32_0 : i32, i32, i32
  }
  func.func @transform_3(%arg0: i32) -> (i32, i32, i32) {
    %c0_i32 = arith.constant 0 : i32
    %c0_i32_0 = arith.constant 0 : i32
    %c0_i32_1 = arith.constant 0 : i32
    return %arg0, %c0_i32, %c0_i32_0 : i32, i32, i32
  }
}

module attributes {stable_mosaic.version = 11 : i64} {
  func.func @_encoder_kernel(%arg0: i32, %arg1: memref<16x4x16xf32, #tpu.memory_space<vmem>>, %arg2: memref<12x128xbf16, #tpu.memory_space<vmem>>, %arg3: memref<1x128xf32, #tpu.memory_space<vmem>>, %arg4: memref<128x128xbf16, #tpu.memory_space<vmem>>, %arg5: memref<1x128xf32, #tpu.memory_space<vmem>>, %arg6: memref<16x128xbf16, #tpu.memory_space<vmem>>) attributes {dimension_semantics = [#tpu.dimension_semantics<parallel>], iteration_bounds = array<i64: 1>, scalar_prefetch = 0 : i64, scratch_operands = 0 : i64, tpu.core_type = #tpu.core_type<tc>, window_params = [{transform_indices = @transform_0, window_bounds = array<i64: 16, 4, 16>}, {pipeline_mode = #tpu.pipeline_mode<synchronous>, transform_indices = @transform_1, window_bounds = array<i64: 12, 128>}, {pipeline_mode = #tpu.pipeline_mode<synchronous>, transform_indices = @transform_2, window_bounds = array<i64: 1, 128>}, {pipeline_mode = #tpu.pipeline_mode<synchronous>, transform_indices = @transform_3, window_bounds = array<i64: 128, 128>}, {pipeline_mode = #tpu.pipeline_mode<synchronous>, transform_indices = @transform_4, window_bounds = array<i64: 1, 128>}, {transform_indices = @transform_5, window_bounds = array<i64: 16, 128>}]} {
    %c0 = arith.constant 0 : index
    %c0_0 = arith.constant 0 : index
    %c0_1 = arith.constant 0 : index
    %0 = vector.load %arg1[%c0, %c0_0, %c0_1] : memref<16x4x16xf32, #tpu.memory_space<vmem>>, vector<16x4x16xf32>
    %1 = tpu.transpose %0, [0, 2, 1] : vector<16x4x16xf32> -> vector<16x16x4xf32>
    %cst = arith.constant 0.000000e+00 : f32
    %2 = vector.broadcast %cst : f32 to vector<16x1x4xf32>
    %3 = tpu.concatenate %2, %1, %2 in 1 : vector<16x1x4xf32>, vector<16x16x4xf32>, vector<16x1x4xf32> -> vector<16x18x4xf32>
    %4 = vector.extract_strided_slice %3 {offsets = [0, 0, 0], sizes = [16, 16, 4], strides = [1, 1, 1]} : vector<16x18x4xf32> to vector<16x16x4xf32>
    %5 = vector.extract_strided_slice %3 {offsets = [0, 1, 0], sizes = [16, 16, 4], strides = [1, 1, 1]} : vector<16x18x4xf32> to vector<16x16x4xf32>
    %6 = vector.extract_strided_slice %3 {offsets = [0, 2, 0], sizes = [16, 16, 4], strides = [1, 1, 1]} : vector<16x18x4xf32> to vector<16x16x4xf32>
    %7 = tpu.concatenate %4, %5, %6 in 2 : vector<16x16x4xf32>, vector<16x16x4xf32>, vector<16x16x4xf32> -> vector<16x16x12xf32>
    %8 = arith.truncf %7 : vector<16x16x12xf32> to vector<16x16x12xbf16>
    %9 = vector.shape_cast %8 : vector<16x16x12xbf16> to vector<256x12xbf16>
    %c0_2 = arith.constant 0 : index
    %c0_3 = arith.constant 0 : index
    %10 = vector.load %arg2[%c0_2, %c0_3] : memref<12x128xbf16, #tpu.memory_space<vmem>>, vector<12x128xbf16>
    %cst_4 = arith.constant dense<0.000000e+00> : vector<256x128xf32>
    %11 = tpu.matmul %9, %10, %cst_4 {dimension_numbers = #tpu.dot_dimension_numbers<[1], [0], [0], [1], [0, 0, 1, 1], [], []>} : vector<256x12xbf16>, vector<12x128xbf16>, vector<256x128xf32> -> vector<256x128xf32>
    %c0_5 = arith.constant 0 : index
    %c0_6 = arith.constant 0 : index
    %12 = vector.load %arg3[%c0_5, %c0_6] : memref<1x128xf32, #tpu.memory_space<vmem>>, vector<1x128xf32>
    %13 = vector.broadcast %12 : vector<1x128xf32> to vector<256x128xf32>
    %14 = arith.addf %11, %13 : vector<256x128xf32>
    %cst_7 = arith.constant 0.000000e+00 : f32
    %15 = vector.broadcast %cst_7 : f32 to vector<256x128xf32>
    %16 = arith.maximumf %14, %15 : vector<256x128xf32>
    %17 = vector.shape_cast %16 : vector<256x128xf32> to vector<16x16x128xf32>
    %cst_8 = arith.constant dense<0.000000e+00> : vector<16x128xf32>
    %18 = vector.multi_reduction <add>, %17, %cst_8 [1] : vector<16x16x128xf32> to vector<16x128xf32>
    %19 = arith.truncf %18 : vector<16x128xf32> to vector<16x128xbf16>
    %c0_9 = arith.constant 0 : index
    %c0_10 = arith.constant 0 : index
    %20 = vector.load %arg4[%c0_9, %c0_10] : memref<128x128xbf16, #tpu.memory_space<vmem>>, vector<128x128xbf16>
    %cst_11 = arith.constant dense<0.000000e+00> : vector<16x128xf32>
    %21 = tpu.matmul %19, %20, %cst_11 {dimension_numbers = #tpu.dot_dimension_numbers<[1], [0], [0], [1], [0, 0, 1, 1], [], []>} : vector<16x128xbf16>, vector<128x128xbf16>, vector<16x128xf32> -> vector<16x128xf32>
    %c0_12 = arith.constant 0 : index
    %c0_13 = arith.constant 0 : index
    %22 = vector.load %arg5[%c0_12, %c0_13] : memref<1x128xf32, #tpu.memory_space<vmem>>, vector<1x128xf32>
    %23 = vector.broadcast %22 : vector<1x128xf32> to vector<16x128xf32>
    %24 = arith.addf %21, %23 : vector<16x128xf32>
    %25 = arith.truncf %24 : vector<16x128xf32> to vector<16x128xbf16>
    %c0_14 = arith.constant 0 : index
    %c0_15 = arith.constant 0 : index
    %26 = vector.load %arg6[%c0_14, %c0_15] : memref<16x128xbf16, #tpu.memory_space<vmem>>, vector<16x128xbf16>
    tpu.vector_store %arg6[%c0_14, %c0_15], %25 {strides = array<i32>} : memref<16x128xbf16, #tpu.memory_space<vmem>>, vector<16x128xbf16>,
    return
  }
  func.func @transform_0(%arg0: i32) -> (i32, i32, i32) {
    %c0_i32 = arith.constant 0 : i32
    %c0_i32_0 = arith.constant 0 : i32
    %c0_i32_1 = arith.constant 0 : i32
    return %arg0, %c0_i32, %c0_i32_0 : i32, i32, i32
  }
  func.func @transform_1(%arg0: i32) -> (i32, i32) {
    %c0_i32 = arith.constant 0 : i32
    %c0_i32_0 = arith.constant 0 : i32
    %c0_i32_1 = arith.constant 0 : i32
    return %c0_i32, %c0_i32_0 : i32, i32
  }
  func.func @transform_2(%arg0: i32) -> (i32, i32) {
    %c0_i32 = arith.constant 0 : i32
    %c0_i32_0 = arith.constant 0 : i32
    %c0_i32_1 = arith.constant 0 : i32
    return %c0_i32, %c0_i32_0 : i32, i32
  }
  func.func @transform_3(%arg0: i32) -> (i32, i32) {
    %c0_i32 = arith.constant 0 : i32
    %c0_i32_0 = arith.constant 0 : i32
    %c0_i32_1 = arith.constant 0 : i32
    return %c0_i32, %c0_i32_0 : i32, i32
  }
  func.func @transform_4(%arg0: i32) -> (i32, i32) {
    %c0_i32 = arith.constant 0 : i32
    %c0_i32_0 = arith.constant 0 : i32
    %c0_i32_1 = arith.constant 0 : i32
    return %c0_i32, %c0_i32_0 : i32, i32
  }
  func.func @transform_5(%arg0: i32) -> (i32, i32) {
    %c0_i32 = arith.constant 0 : i32
    %c0_i32_0 = arith.constant 0 : i32
    return %arg0, %c0_i32 : i32, i32
  }
}

</mosaic_0001>

<bundles_post_ra>
// kernel: _forward_impl.5
= control target key start
LH: loop header
LB: loop body
LE: loop exit
PB: predicated region body
PF: predicated region fallthrough
CT: control target
= control target key end

     0   :  { %s891_s12 = smov 0   ;;  %s1006_s0 = inlined_call_operand.vmem [shape: bf16[2,8,128], index: 0, kind: input, shape index: {}]   ;;  %s1007_s1 = inlined_call_operand.vmem [shape: f32[2,128,8], index: 1, kind: input, shape index: {}]   ;;  %s1008_s2 = inlined_call_operand.vmem [shape: bf16[2,8,128], index: 2, kind: input, shape index: {}]   ;;  %s1009_s3 = inlined_call_operand.vmem [shape: f32[2,8,128], index: 3, kind: output, shape index: {}]  }
   0x1 LB: > { %s748_s13 = sadd.s32 4294967295, %s867_s12   ;;  %p752_p0 = scmp.ge.s32.totalorder %s867_s12, 1  ;;  %s867_s12 = sphi %s891_s12, %s13_s12  }
   0x2   : > { %p155_p1 = scmp.lt.s32.totalorder %s867_s12, 3 }
   0x4   : > { %p156_p2 = pnand %p752_p0, %p155_p1 }
   0x5   : > { %p186_p3 = scmp.lt.s32.totalorder (!%p156_p2), %s748_s13, 1  ;;  %vm224_vm0 = vcmask (!%p156_p2), 64512   ;;  %v869_v18 = vmov (!%p156_p2), 0.0   ;;  %vm870_vm1 = vmmov (!%p156_p2), 0   ;;  %vm545_vm2 = vcmask (!%p156_p2), 130112  }
   0x6   : > { %159 = sbr.rel (%p156_p2) target bundleno = 535 (0x217), region = 32  ;;  %829 = vmatprep.subr.bf16.mxu1 (!%p156_p2), %v869_v18  ;;  %845 = vmatprep.mubr.msk.bf16.mxu1 (!%p156_p2), %vm870_vm1, %v869_v18  ;;  %vm552_vm3 = vcmask (!%p156_p2), 195712   ;;  %vm559_vm4 = vcmask (!%p156_p2), 261312   ;;  %vm566_vm5 = vcmask (!%p156_p2), 326912   ;;  %vm573_vm6 = vcmask (!%p156_p2), 392512  }
   0x7   : > { %vm580_vm7 = vcmask (!%p156_p2), 458112   ;;  %vm587_vm8 = vcmask (!%p156_p2), 523712   ;;  %vm594_vm9 = vcmask (!%p156_p2), 589312   ;;  %vm601_vm10 = vcmask (!%p156_p2), 654912  }
   0x8   : > { %vm608_vm11 = vcmask (!%p156_p2), 720512   ;;  %vm615_vm12 = vcmask (!%p156_p2), 786112   ;;  %vm622_vm13 = vcmask (!%p156_p2), 851712   ;;  %vm629_vm14 = vcmask (!%p156_p2), 917312  }
   0x9   : > { %vm636_vm15 = vcmask (!%p156_p2), 982912  }
   0xd   : > { %s1011_s13 = smov (!%p186_p3, %s748_s13), 1 }
   0xe   : > { %s753_s14 = sshll.u32 %s1011_s13, 2  ;;  %s776_s15 = sshll.u32 %s1011_s13, 7 }
   0xf   : > { %s189_s18 = scalar_lea.vmem %s1006_s0, %s753_s14  ;;  %s911_s21 = scalar_lea.vmem %s1007_s1, %s776_s15 }
  0x10   : > { %v204_v0 = vld [vmem:[%s189_s18] sm:$0xf]  ;;  %v209_v3 = vld [vmem:[%s911_s21 + $0x8] sm:$0xff]  ;;  %v210_v4 = vld [vmem:[%s911_s21 + $0x10] sm:$0xff]  ;;  %s955_s24 = scalar_lea.vmem %s1008_s2, %s753_s14  ;;  %s757_s25 = sshll.u32 %s1011_s13, 3 }
  0x11   : > { %v208_v1 = vld [vmem:[%s911_s21] sm:$0xff]  ;;  %v205_v2 = vunpack.c.l.bf16 %v204_v0  ;;  %v211_v5 = vld [vmem:[%s911_s21 + $0x18] sm:$0xff]  ;;  %v213_v7 = vld [vmem:[%s911_s21 + $0x28] sm:$0xff]  ;;  %s202_s28 = scalar_lea.vmem %s1009_s3, %s757_s25 }
  0x12   : > { %805 = vmatprep.mubr.msk.f32.mxu0 %vm224_vm0, %v208_v1  ;;  %v212_v6 = vld [vmem:[%s911_s21 + $0x20] sm:$0xff]  ;;  %v214_v8 = vld [vmem:[%s911_s21 + $0x30] sm:$0xff]  ;;  %v215_v9 = vld [vmem:[%s911_s21 + $0x38] sm:$0xff]  ;;  %v534_v1 = vlaneseq }
  0x13   : > { %803 = vmatprep.subr.mxu0 %v205_v2  ;;  %v216_v10 = vld [vmem:[%s911_s21 + $0x40] sm:$0xff]  ;;  %v217_v11 = vld [vmem:[%s911_s21 + $0x48] sm:$0xff]  ;;  %v218_v12 = vld [vmem:[%s911_s21 + $0x50] sm:$0xff] }
  0x14   : > { %804 = vmatpush3.msra.mxu0 %v205_v2  ;;  %v219_v13 = vld [vmem:[%s911_s21 + $0x58] sm:$0xff]  ;;  %v220_v14 = vld [vmem:[%s911_s21 + $0x60] sm:$0xff]  ;;  %v221_v15 = vld [vmem:[%s911_s21 + $0x68] sm:$0xff]  ;;  %v963_v2 = vand.u32 127, %v534_v1 }
  0x15   : > { %806 = vmatmul.mubr.msk.f32.vlgmr.msra.gmra.mrb[0].mxu0 %vm224_vm0, %v209_v3  ;;  %v222_v16 = vld [vmem:[%s911_s21 + $0x70] sm:$0xff]  ;;  %v223_v17 = vld [vmem:[%s911_s21 + $0x78] sm:$0xff]  ;;  %v206_v51 = vld [vmem:[%s955_s24] sm:$0xf] }
  0x16   : > { %808 = vmatprep.mubr.msk.f32.mxu0 %vm224_vm0, %v210_v4  ;;  %v207_v56 = vunpack.c.l.bf16 %v206_v51  ;;  %v418_v62 = vld [vmem:[%s955_s24] sm:$0xf]  ;;  %v617_v51 = vadd.s32 4294967200, %v963_v2 }
  0x18   : > { %v467_v61 = vmul.f32 %v207_v56, %v207_v56 }
  0x19   : > { %809 = vmatmul.mubr.msk.f32.gmra.mrb[2].mxu0 %vm224_vm0, %v211_v5  ;;  %v547_v5 = vadd.s32 4294967280, %v963_v2 }
  0x1a   : > { %811 = vmatprep.mubr.msk.f32.mxu0 %vm224_vm0, %v212_v6  ;;  %v966_v6 = vshrl.u32 %v534_v1, 7  ;;  %v638_v1 = vadd.s32 4294967176, %v963_v2 }
  0x1d   : > { %812 = vmatmul.mubr.msk.f32.gmra.mrb[4].mxu0 %vm224_vm0, %v213_v7  ;;  %v540_v7 = vadd.s32 4294967288, %v963_v2 }
  0x1e   : > { %814 = vmatprep.mubr.msk.f32.mxu0 %vm224_vm0, %v214_v8  ;;  %v538_v8 = vsub.s32 %v963_v2, %v966_v6 }
  0x21   : > { %815 = vmatmul.mubr.msk.f32.gmra.mrb[6].mxu0 %vm224_vm0, %v215_v9  ;;  %v554_v9 = vadd.s32 4294967272, %v963_v2 }
  0x22   : > { %817 = vmatprep.mubr.msk.f32.mxu0 %vm224_vm0, %v216_v10 }
  0x25   : > { %818 = vmatmul.mubr.msk.f32.gmra.mrb[8].mxu0 %vm224_vm0, %v217_v11  ;;  %v550_v11 = vsub.s32 %v547_v5, %v966_v6 }
  0x26   : > { %820 = vmatprep.mubr.msk.f32.mxu0 %vm224_vm0, %v218_v12 }
  0x29   : > { %821 = vmatmul.mubr.msk.f32.gmra.mrb[10].mxu0 %vm224_vm0, %v219_v13  ;;  %v543_v13 = vsub.s32 %v540_v7, %v966_v6 }
  0x2a   : > { %823 = vmatprep.mubr.msk.f32.mxu0 %vm224_vm0, %v220_v14  ;;  %v561_v14 = vadd.s32 4294967264, %v963_v2 }
  0x2d   : > { %824 = vmatmul.mubr.msk.f32.gmra.mrb[12].mxu0 %vm224_vm0, %v221_v15 }
  0x2e   : > { %826 = vmatprep.mubr.msk.f32.mxu0 %vm224_vm0, %v222_v16  ;;  %v557_v16 = vsub.s32 %v554_v9, %v966_v6 }
  0x31   : > { %827 = vmatmul.mubr.msk.f32.gmra.mrb[14].mxu0 %vm224_vm0, %v223_v17  ;;  %vm643_vm0 = vcmask 1048512  }
  0xe8   : > { %v807_v19 = vpop.f32.mrb[0].mxu0 }
  0xe9   : > { %v339_v20 = vpop.f32.mrb[1].mxu0  ;;  %v471_v21 = vmul.f32 %v807_v19, %v807_v19 }
  0xea   : > { %v419_v22 = vpack.c.bf16 %v807_v19, %v339_v20  ;;  %v470_v24 = vmul.f32 %v339_v20, %v339_v20  ;;  %v568_v19 = vadd.s32 4294967256, %v963_v2 }
  0xeb   : > { %488 = vadd.xlane.f32.xlu0 %v471_v21  ;;  %v564_v21 = vsub.s32 %v561_v14, %v966_v6 }
  0xec   : > { %v810_v23 = vpop.f32.mrb[2].mxu0  ;;  %830 = vmatpush3.bf16.xpose.msra.mxu1 %v419_v22 }
  0xed   : > { %v473_v25 = vmul.f32 %v810_v23, %v810_v23  ;;  %v349_v26 = vpop.f32.mrb[3].mxu0  ;;  %831 = vmatprep.subr.bf16.mxu1 %v869_v18 }
  0xee   : > { %v420_v27 = vpack.c.bf16 %v810_v23, %v349_v26  ;;  %v472_v28 = vmul.f32 %v349_v26, %v349_v26  ;;  %v575_v26 = vadd.s32 4294967248, %v963_v2 }
  0xef   : > { %486 = vadd.xlane.f32.xlu0 %v470_v24  ;;  %492 = vadd.xlane.f32.xlu1 %v473_v25 }
  0xf0   : > { %v813_v29 = vpop.f32.mrb[4].mxu0 }
  0xf1   : > { %v359_v30 = vpop.f32.mrb[5].mxu0  ;;  %v475_v33 = vmul.f32 %v813_v29, %v813_v29 }
  0xf2   : > { %v421_v31 = vpack.c.bf16 %v813_v29, %v359_v30  ;;  %v474_v32 = vmul.f32 %v359_v30, %v359_v30 }
  0xf3   : > { %490 = vadd.xlane.f32.xlu1 %v472_v28  ;;  %v582_v28 = vadd.s32 4294967240, %v963_v2 }
  0xf4   : > { %832 = vmatpush3.bf16.xpose.msra.mxu1 %v420_v27  ;;  %494 = vadd.xlane.f32.xlu0 %v474_v32  ;;  %v816_v34 = vpop.f32.mrb[6].mxu0  ;;  %v571_v27 = vsub.s32 %v568_v19, %v966_v6  ;;  %v578_v32 = vsub.s32 %v575_v26, %v966_v6 }
  0xf5   : > { %v369_v35 = vpop.f32.mrb[7].mxu0  ;;  %833 = vmatprep.subr.bf16.mxu1 %v869_v18  ;;  %v477_v38 = vmul.f32 %v816_v34, %v816_v34 }
  0xf6   : > { %v422_v36 = vpack.c.bf16 %v816_v34, %v369_v35  ;;  %v476_v37 = vmul.f32 %v369_v35, %v369_v35 }
  0xf7   : > { %496 = vadd.xlane.f32.xlu1 %v475_v33  ;;  %v589_v33 = vadd.s32 4294967232, %v963_v2 }
  0xf8   : > { %498 = vadd.xlane.f32.xlu0 %v476_v37  ;;  %v819_v39 = vpop.f32.mrb[8].mxu0  ;;  %v596_v37 = vadd.s32 4294967224, %v963_v2 }
  0xf9   : > { %v379_v40 = vpop.f32.mrb[9].mxu0  ;;  %v479_v43 = vmul.f32 %v819_v39, %v819_v39 }
  0xfa   : > { %v423_v41 = vpack.c.bf16 %v819_v39, %v379_v40  ;;  %v478_v42 = vmul.f32 %v379_v40, %v379_v40  ;;  %v592_v40 = vsub.s32 %v589_v33, %v966_v6 }
  0xfb   : > { %500 = vadd.xlane.f32.xlu1 %v477_v38 }
  0xfc   : > { %834 = vmatpush3.bf16.xpose.msra.mxu1 %v421_v31  ;;  %502 = vadd.xlane.f32.xlu0 %v478_v42  ;;  %v822_v44 = vpop.f32.mrb[10].mxu0 }
  0xfd   : > { %v389_v45 = vpop.f32.mrb[11].mxu0  ;;  %835 = vmatprep.subr.bf16.mxu1 %v869_v18  ;;  %v481_v48 = vmul.f32 %v822_v44, %v822_v44 }
  0xfe   : > { %v424_v46 = vpack.c.bf16 %v822_v44, %v389_v45  ;;  %v480_v47 = vmul.f32 %v389_v45, %v389_v45  ;;  %v599_v44 = vsub.s32 %v596_v37, %v966_v6 }
  0xff   : > { %504 = vadd.xlane.f32.xlu1 %v479_v43 }
 0x100   : > { %506 = vadd.xlane.f32.xlu0 %v480_v47  ;;  %v825_v49 = vpop.f32.mrb[12].mxu0 }
 0x101   : > { %v399_v50 = vpop.f32.mrb[13].mxu0  ;;  %v483_v54 = vmul.f32 %v825_v49, %v825_v49 }
 0x102   : > { %v425_v52 = vpack.c.bf16 %v825_v49, %v399_v50  ;;  %v482_v53 = vmul.f32 %v399_v50, %v399_v50 }
 0x103   : > { %508 = vadd.xlane.f32.xlu1 %v481_v48 }
 0x104   : > { %836 = vmatpush3.bf16.xpose.msra.mxu1 %v422_v36  ;;  %510 = vadd.xlane.f32.xlu0 %v482_v53  ;;  %v828_v55 = vpop.f32.mrb[14].mxu0  ;;  %v585_v36 = vsub.s32 %v582_v28, %v966_v6 }
 0x105   : > { %v409_v57 = vpop.f32.mrb[15].mxu0  ;;  %837 = vmatprep.subr.bf16.mxu1 %v869_v18  ;;  %v485_v60 = vmul.f32 %v828_v55, %v828_v55 }
 0x106   : > { %v426_v58 = vpack.c.bf16 %v828_v55, %v409_v57  ;;  %v484_v59 = vmul.f32 %v409_v57, %v409_v57  ;;  %v624_v55 = vadd.s32 4294967192, %v963_v2 }
 0x107   : > { %512 = vadd.xlane.f32.xlu1 %v483_v54 }
 0x108   : > { %514 = vadd.xlane.f32.xlu0 %v484_v59  ;;  %v620_v59 = vsub.s32 %v617_v51, %v966_v6 }
 0x10b   : > { %516 = vadd.xlane.f32.xlu1 %v485_v60 }
 0x10c   : > { %838 = vmatpush3.bf16.xpose.msra.mxu1 %v423_v41  ;;  %468 = vadd.xlane.f32.xlu0 %v467_v61  ;;  %v603_v41 = vadd.s32 4294967216, %v963_v2  ;;  %v631_v61 = vadd.s32 4294967184, %v963_v2 }
 0x10d   : > { %839 = vmatprep.subr.bf16.mxu1 %v869_v18 }
 0x10e   : > { %v606_v50 = vsub.s32 %v603_v41, %v966_v6  ;;  %v634_v5 = vsub.s32 %v631_v61, %v966_v6 }
 0x114   : > { %840 = vmatpush3.bf16.xpose.msra.mxu1 %v424_v46  ;;  %v610_v46 = vadd.s32 4294967208, %v963_v2 }
 0x115   : > { %841 = vmatprep.subr.bf16.mxu1 %v869_v18 }
 0x116   : > { %v613_v54 = vsub.s32 %v610_v46, %v966_v6 }
 0x11c   : > { %842 = vmatpush3.bf16.xpose.msra.mxu1 %v425_v52 }
 0x11d   : > { %843 = vmatprep.subr.bf16.mxu1 %v869_v18 }
 0x124   : > { %844 = vmatpush3.bf16.xpose.msra.mxu1 %v426_v58 }
 0x12b   : > { %846 = vmatmul.mubr.bf16.vlgmr.msra.gmra.mrb[0].mxu1 %v418_v62 }
 0x178   : > { %v489_v63 = vpop.xlane.xlu0 %488 }
 0x179   : > { %v544_v18 = vrot.slane %v489_v63, %v543_v13 }
 0x17c   : > { %v493_v0 = vpop.xlane.xlu1 %492  ;;  %v487_v3 = vpop.xlane.xlu0 %486 }
 0x17d   : > { %v539_v15 = vrot.slane %v487_v3, %v538_v8  ;;  %v558_v24 = vrot.slane %v493_v0, %v557_v16  ;;  %v627_v0 = vsub.s32 %v624_v55, %v966_v6 }
 0x17f   : > { %v546_v23 = vsel %vm545_vm2, %v544_v18, %v539_v15 }
 0x180   : > { %v491_v4 = vpop.xlane.xlu1 %490 }
 0x181   : > { %v495_v10 = vpop.xlane.xlu0 %494  ;;  %v551_v17 = vrot.slane %v491_v4, %v550_v11 }
 0x182   : > { %v565_v29 = vrot.slane %v495_v10, %v564_v21  ;;  %v641_v10 = vsub.s32 %v638_v1, %v966_v6 }
 0x183   : > { %v553_v25 = vsel %vm552_vm3, %v551_v17, %v546_v23 }
 0x184   : > { %v497_v12 = vpop.xlane.xlu1 %496  ;;  %v560_v30 = vsel %vm559_vm4, %v558_v24, %v553_v25 }
 0x185   : > { %v499_v20 = vpop.xlane.xlu0 %498  ;;  %v572_v35 = vrot.slane %v497_v12, %v571_v27  ;;  %v567_v38 = vsel %vm566_vm5, %v565_v29, %v560_v30 }
 0x186   : > { %v579_v39 = vrot.slane %v499_v20, %v578_v32 }
 0x187   : > { %v574_v42 = vsel %vm573_vm6, %v572_v35, %v567_v38 }
 0x188   : > { %v501_v22 = vpop.xlane.xlu1 %500  ;;  %v581_v48 = vsel %vm580_vm7, %v579_v39, %v574_v42 }
 0x189   : > { %v503_v31 = vpop.xlane.xlu0 %502  ;;  %v586_v43 = vrot.slane %v501_v22, %v585_v36 }
 0x18a   : > { %v593_v49 = vrot.slane %v503_v31, %v592_v40 }
 0x18b   : > { %v588_v52 = vsel %vm587_vm8, %v586_v43, %v581_v48 }
 0x18c   : > { %v505_v34 = vpop.xlane.xlu1 %504  ;;  %v595_v57 = vsel %vm594_vm9, %v593_v49, %v588_v52 }
 0x18d   : > { %v507_v45 = vpop.xlane.xlu0 %506  ;;  %v600_v53 = vrot.slane %v505_v34, %v599_v44 }
 0x18e   : > { %v607_v58 = vrot.slane %v507_v45, %v606_v50 }
 0x18f   : > { %v602_v62 = vsel %vm601_vm10, %v600_v53, %v595_v57 }
 0x190   : > { %v509_v47 = vpop.xlane.xlu1 %508  ;;  %v609_v3 = vsel %vm608_vm11, %v607_v58, %v602_v62 }
 0x191   : > { %v511_v56 = vpop.xlane.xlu0 %510  ;;  %v614_v63 = vrot.slane %v509_v47, %v613_v54 }
 0x192   : > { %v621_v4 = vrot.slane %v511_v56, %v620_v59 }
 0x193   : > { %v616_v7 = vsel %vm615_vm12, %v614_v63, %v609_v3 }
 0x194   : > { %v513_v60 = vpop.xlane.xlu1 %512  ;;  %v623_v12 = vsel %vm622_vm13, %v621_v4, %v616_v7 }
 0x195   : > { %v628_v8 = vrot.slane %v513_v60, %v627_v0  ;;  %v515_v9 = vpop.xlane.xlu0 %514 }
 0x196   : > { %v635_v13 = vrot.slane %v515_v9, %v634_v5 }
 0x197   : > { %v630_v14 = vsel %vm629_vm14, %v628_v8, %v623_v12 }
 0x198   : > { %v517_v11 = vpop.xlane.xlu1 %516  ;;  %v637_v2 = vsel %vm636_vm15, %v635_v13, %v630_v14 }
 0x199   : > { %v642_v15 = vrot.slane %v517_v11, %v641_v10  ;;  %v469_v17 = vpop.xlane.xlu0 %468 }
 0x19b   : > { %v644_v16 = vsel %vm643_vm0, %v642_v15, %v637_v2 }
 0x19c   : > { %v658_v19 = vadd.f32 %v644_v16, %v469_v17 }
 0x1fe   : > { %v461_v18 = vpop.f32.mrb[0].mxu1 }
 0x1ff   : > { %v659_v20 = vmul.f32 2.0, %v461_v18  ;;  %v847_v21 = vpop.f32.mrb[1].mxu1 }
 0x200   : > { %v464_v22 = vpop.f32.mrb[2].mxu1 }
 0x201   : > { %v660_v23 = vsub.f32 %v658_v19, %v659_v20  ;;  %v848_v24 = vpop.f32.mrb[3].mxu1 }
 0x203   : > { %v661_v6 = vmax.f32 %v660_v23, 0.0 }
 0x205   : > { %859 = vrsqrt.f32 %v661_v6  ;;  %vm664_vm1 = vcmp.eq.f32.partialorder %v661_v6, inf  ;;  %v667_v27 = vand.u32 2147483648, %v661_v6  ;;  %vm666_vm2 = vcmp.eq.f32.partialorder %v661_v6, 0.0 }
 0x20f   : > { %v860_v25 = vpop.eup %859 }
 0x210   : > { %v663_v26 = vmul.f32 %v860_v25, %v661_v6 }
 0x212   : > { %v665_v28 = vsel %vm664_vm1, %v661_v6, %v663_v26 }
 0x213   : > { %v668_v29 = vsel %vm666_vm2, %v667_v27, %v665_v28 }
 0x214   : > { %v669_v30 = vsub.f32 0.0, %v668_v29 }
 0x216   : > { %670 = vst [vmem:[%s202_s28] sm:$0xff] %v669_v30 }
 0x217 PF: > { %s13_s12 = sadd.s32 1, %s867_s12  }
 0x218   : > { %p10_p4 = scmp.ge.s32.totalorder %s13_s12, 4  }
 0x21a   :  { %12 = sbr.rel (!%p10_p4) target bundleno = 1 (0x1), region = 68 }

// kernel: _forward_impl.4
= control target key start
LH: loop header
LB: loop body
LE: loop exit
PB: predicated region body
PF: predicated region fallthrough
CT: control target
= control target key end

     0   :  { %vm581_vm0 = vcmask 1040384   ;;  %vm742_vm1 = vcmask 1046528   ;;  %s2132_s21 = smov 4   ;;  %vm919_vm2 = vcmask 1045504   ;;  %s2133_s24 = smov 8   ;;  %vm1096_vm3 = vcmask 31744   ;;  %s2771_s0 = inlined_call_operand.vmem [shape: f32[16,4,16], index: 0, kind: input, shape index: {}]   ;;  %s2772_s1 = inlined_call_operand.vmem [shape: bf16[12,128], index: 1, kind: input, shape index: {}]   ;;  %s2773_s2 = inlined_call_operand.vmem [shape: f32[1,128], index: 2, kind: input, shape index: {}]   ;;  %s2774_s3 = inlined_call_operand.vmem [shape: bf16[128,128], index: 3, kind: input, shape index: {}]   ;;  %s2775_s4 = inlined_call_operand.vmem [shape: f32[1,128], index: 4, kind: input, shape index: {}]   ;;  %s2776_s5 = inlined_call_operand.vmem [shape: bf16[16,128], index: 5, kind: output, shape index: {}]  }
   0x1   :  { %v21_v0 = vld [vmem:[%s2771_s0] sm:$0xf]  ;;  %v22_v1 = vld [vmem:[%s2771_s0 + $0x4] sm:$0xf]  ;;  %v23_v2 = vld [vmem:[%s2771_s0 + $0x8] sm:$0xf] }
   0x2   :  { %v1867_v3 = vpack.i.bf16 %v22_v1, %v21_v0  ;;  %v24_v4 = vld [vmem:[%s2771_s0 + $0xc] sm:$0xf]  ;;  %v25_v5 = vld [vmem:[%s2771_s0 + $0x10] sm:$0xf]  ;;  %v26_v6 = vld [vmem:[%s2771_s0 + $0x14] sm:$0xf] }
   0x3   :  { %v1891_v7 = vpack.i.bf16 %v26_v6, %v25_v5  ;;  %v27_v8 = vld [vmem:[%s2771_s0 + $0x18] sm:$0xf]  ;;  %v28_v9 = vld [vmem:[%s2771_s0 + $0x1c] sm:$0xf]  ;;  %v1879_v10 = vpack.i.bf16 %v24_v4, %v23_v2  ;;  %v29_v12 = vld [vmem:[%s2771_s0 + $0x20] sm:$0xf] }
   0x4   :  { %1868 = vxpose.xlu0.b32.start.end [1/1] (short) (narrow) %v1867_v3, 16  ;;  %v1903_v11 = vpack.i.bf16 %v28_v9, %v27_v8  ;;  %v30_v13 = vld [vmem:[%s2771_s0 + $0x24] sm:$0xf]  ;;  %v31_v14 = vld [vmem:[%s2771_s0 + $0x28] sm:$0xf]  ;;  %vm1129_vm4 = vcmask 64512  }
   0x5   :  { %1892 = vxpose.xlu1.b32.start.end [1/1] (short) (narrow) %v1891_v7, 16  ;;  %v32_v15 = vld [vmem:[%s2771_s0 + $0x2c] sm:$0xf]  ;;  %v1915_v16 = vpack.i.bf16 %v30_v13, %v29_v12  ;;  %v33_v18 = vld [vmem:[%s2771_s0 + $0x30] sm:$0xf]  ;;  %vm1192_vm5 = vcmask 97280  }
   0x6   :  { %v1927_v17 = vpack.i.bf16 %v32_v15, %v31_v14  ;;  %v34_v19 = vld [vmem:[%s2771_s0 + $0x34] sm:$0xf]  ;;  %vm1620_vm6 = vcmask 1041409   ;;  %vm1622_vm7 = vcmask 1042434   ;;  %vm1624_vm8 = vcmask 1043459  }
   0x7   :  { %v1939_v20 = vpack.i.bf16 %v34_v19, %v33_v18  ;;  %vm2135_vm9 = vmmov 0   ;;  %vm1626_vm10 = vcmask 1044484   ;;  %vm1628_vm11 = vcmask 1045509  }
   0x8   :  { %vm1630_vm12 = vcmask 1046534   ;;  %vm1632_vm13 = vcmask 1047559  }
   0x9   :  { %1880 = vxpose.xlu0.b32.start.end [1/1] (short) (narrow) %v1879_v10, 16 }
   0xa   :  { %1904 = vxpose.xlu1.b32.start.end [1/1] (short) (narrow) %v1903_v11, 16 }
   0xe   :  { %1916 = vxpose.xlu0.b32.start.end [1/1] (short) (narrow) %v1915_v16, 16 }
   0xf   :  { %1928 = vxpose.xlu1.b32.start.end [1/1] (short) (narrow) %v1927_v17, 16 }
  0x14   :  { %1940 = vxpose.xlu1.b32.start.end [1/1] (short) (narrow) %v1939_v20, 16 }
  0x84   :  { %v1869_v21 = vpop.trf.xlu0 }
  0x85   :  { %v1873_v22 = vunpack.i.h.bf16 %v1869_v21  ;;  %v1870_v23 = vunpack.i.l.bf16 %v1869_v21  ;;  %v1893_v24 = vpop.trf.xlu1 }
  0x86   :  { %v1897_v25 = vunpack.i.h.bf16 %v1893_v24  ;;  %v1894_v28 = vunpack.i.l.bf16 %v1893_v24 }
  0x87   :  { %v585_v26 = vrot.slane %v1873_v22, 7  ;;  %v582_v27 = vrot.slane %v1870_v23, 7 }
  0x88   :  { %v1874_v29 = vpop.trf.xlu0  ;;  %v2208_v32 = vrot.slane %v1897_v25, 7  ;;  %v2216_v36 = vrot.slane %v1894_v28, 7  ;;  %v2288_v28 = vld [vmem:[%s2772_s1] sm:$0x3f]  }
  0x89   :  { %v1878_v30 = vunpack.i.h.bf16 %v1874_v29  ;;  %v1875_v31 = vunpack.i.l.bf16 %v1874_v29  ;;  %v2211_v33 = vsel %vm581_vm0, 0.0, %v585_v26  ;;  %v2214_v34 = vsel %vm581_vm0, 0.0, %v582_v27  ;;  %v1898_v37 = vpop.trf.xlu1  ;;  %1862 = vmatprep.subr.msk.bf16.mxu0 %vm919_vm2, %v2288_v28 }
  0x8a   :  { %v1902_v40 = vunpack.i.h.bf16 %v1898_v37  ;;  %v748_v47 = vrot.slane %v2211_v33, 1  ;;  %v743_v49 = vrot.slane %v2214_v34, 1  ;;  %v1899_v50 = vunpack.i.l.bf16 %v1898_v37 }
  0x8b   :  { %v586_v35 = vrot.slane %v1878_v30, 7  ;;  %v583_v38 = vrot.slane %v1875_v31, 7  ;;  %v2242_v5 = vsel %vm581_vm0, 0.0, %v2208_v32  ;;  %v2246_v6 = vsel %vm581_vm0, 0.0, %v2216_v36 }
  0x8c   :  { %v1881_v39 = vpop.trf.xlu0  ;;  %v2233_v57 = vrot.slane %v1902_v40, 7  ;;  %v595_v14 = vrot.slane %v1899_v50, 7  ;;  %v920_v16 = vrot.slane %v2214_v34, 2 }
  0x8d   :  { %v2219_v41 = vsel %vm581_vm0, %v586_v35, 0.0  ;;  %v2222_v42 = vsel %vm581_vm0, %v585_v26, %v586_v35  ;;  %v1885_v43 = vunpack.i.h.bf16 %v1881_v39  ;;  %v2226_v45 = vsel %vm581_vm0, %v582_v27, %v583_v38  ;;  %v2273_v19 = vpop.trf.xlu1 }
  0x8e   :  { %v751_v44 = vrot.slane %v2219_v41, 1  ;;  %v694_v46 = vsel %vm581_vm0, %v583_v38, 0.0  ;;  %v1882_v52 = vunpack.i.l.bf16 %v1881_v39  ;;  %v749_v54 = vrot.slane %v2222_v42, 1 }
  0x8f   :  { %v746_v48 = vrot.slane %v694_v46, 1  ;;  %v591_v51 = vrot.slane %v1885_v43, 7  ;;  %v744_v55 = vrot.slane %v2226_v45, 1  ;;  %v928_v4 = vrot.slane %v2219_v41, 2 }
  0x90   :  { %v1886_v53 = vpop.trf.xlu0  ;;  %v588_v58 = vrot.slane %v1882_v52, 7  ;;  %v750_v60 = vsel %vm742_vm1, %v748_v47, %v749_v54  ;;  %v752_v61 = vsel %vm742_vm1, %v749_v54, %v751_v44  ;;  %v923_v7 = vrot.slane %v694_v46, 2 }
  0x91   :  { %v1890_v56 = vunpack.i.h.bf16 %v1886_v53  ;;  %v1887_v59 = vunpack.i.l.bf16 %v1886_v53  ;;  %v1956_v63 = vpack.i.bf16 %v752_v61, %v750_v60  ;;  %v745_v0 = vsel %vm742_vm1, %v743_v49, %v744_v55 }
  0x92   :  { %v747_v1 = vsel %vm742_vm1, %v744_v55, %v746_v48  ;;  %v2250_v8 = vsel %vm581_vm0, 0.0, %v588_v58  ;;  %v2260_v11 = vsel %vm581_vm0, 0.0, %v591_v51  ;;  %v2267_v13 = vsel %vm581_vm0, %v2233_v57, 0.0  ;;  %v1910_v48 = vpop.trf.xlu1 }
  0x93   :  { %v592_v62 = vrot.slane %v1890_v56, 7  ;;  %v589_v2 = vrot.slane %v1887_v59, 7  ;;  %v1951_v3 = vpack.i.bf16 %v747_v1, %v745_v0  ;;  %1957 = vrot.lane.b32.xlu1 %v1956_v63, %s2132_s21  ;;  %v921_v17 = vrot.slane %v2226_v45, 2 }
  0x94   :  { %v926_v18 = vrot.slane %v2222_v42, 2  ;;  %v698_v21 = vsel %vm581_vm0, %v595_v14, 0.0  ;;  %v753_v22 = vrot.slane %v2250_v8, 1  ;;  %v925_v27 = vrot.slane %v2211_v33, 2 }
  0x95   :  { %v2253_v9 = vsel %vm581_vm0, %v588_v58, %v589_v2  ;;  %v2256_v10 = vsel %vm581_vm0, %v589_v2, 0.0  ;;  %1952 = vrot.lane.b32.xlu0 %v1951_v3, %s2132_s21  ;;  %v2263_v12 = vsel %vm581_vm0, %v592_v62, 0.0  ;;  %v2276_v20 = vsel %vm581_vm0, %v591_v51, %v592_v62 }
  0x96   :  { %v756_v15 = vrot.slane %v2256_v10, 1  ;;  %v754_v23 = vrot.slane %v2253_v9, 1  ;;  %v761_v24 = vrot.slane %v2263_v12, 1  ;;  %v922_v25 = vsel %vm919_vm2, %v920_v16, %v921_v17 }
  0x97   :  { %v924_v26 = vsel %vm919_vm2, %v921_v17, %v923_v7  ;;  %v2292_v29 = vsel %vm581_vm0, %v2216_v36, %v595_v14  ;;  %v766_v30 = vrot.slane %v698_v21, 1  ;;  %v927_v37 = vsel %vm919_vm2, %v925_v27, %v926_v18 }
  0x98   :  { %v1961_v31 = vpack.i.bf16 %v924_v26, %v922_v25  ;;  %v755_v35 = vsel %vm742_vm1, %v753_v22, %v754_v23  ;;  %v929_v38 = vsel %vm919_vm2, %v926_v18, %v928_v4  ;;  %v757_v39 = vsel %vm742_vm1, %v754_v23, %v756_v15  ;;  %v2320_v4 = vpop.trf.xlu0 }
  0x99   :  { %v1971_v40 = vpack.i.bf16 %v757_v39, %v755_v35  ;;  %v1906_v36 = vunpack.i.l.bf16 %v2273_v19  ;;  %v763_v41 = vrot.slane %v2246_v6, 1  ;;  %v948_v43 = vrot.slane %v2267_v13, 2 }
  0x9a   :  { %1962 = vrot.lane.b32.xlu1 %v1961_v31, %s2133_s24  ;;  %v764_v44 = vrot.slane %v2292_v29, 1  ;;  %v758_v46 = vrot.slane %v2260_v11, 1  ;;  %v759_v47 = vrot.slane %v2276_v20, 1  ;;  %v933_v49 = vrot.slane %v2256_v10, 2 }
  0x9b   :  { %v1966_v50 = vpack.i.bf16 %v929_v38, %v927_v37  ;;  %1972 = vrot.lane.b32.xlu0 %v1971_v40, %s2132_s21  ;;  %v600_v51 = vrot.slane %v1906_v36, 7  ;;  %v943_v55 = vrot.slane %v698_v21, 2  ;;  %v1914_v59 = vunpack.i.h.bf16 %v1910_v48 }
  0x9c   :  { %v765_v52 = vsel %vm742_vm1, %v763_v41, %v764_v44  ;;  %v767_v53 = vsel %vm742_vm1, %v764_v44, %v766_v30  ;;  %v760_v54 = vsel %vm742_vm1, %v758_v46, %v759_v47  ;;  %v762_v58 = vsel %vm742_vm1, %v759_v47, %v761_v24  ;;  %v1929_v30 = vpop.trf.xlu1  ;;  %v2350_v39 = vpop.trf.xlu0 }
  0x9d   :  { %v2003_v56 = vpack.i.bf16 %v767_v53, %v765_v52  ;;  %v1976_v60 = vpack.i.bf16 %v762_v58, %v760_v54  ;;  %v1911_v61 = vunpack.i.l.bf16 %v1910_v48  ;;  %v940_v62 = vrot.slane %v2246_v6, 2 }
  0x9e   :  { %1967 = vrot.lane.b32.xlu1 %v1966_v50, %s2133_s24  ;;  %v941_v63 = vrot.slane %v2292_v29, 2  ;;  %v938_v0 = vrot.slane %v2263_v12, 2  ;;  %v1909_v1 = vunpack.i.h.bf16 %v2273_v19  ;;  %v930_v2 = vrot.slane %v2250_v8, 2 }
  0x9f   :  { %v931_v3 = vrot.slane %v2253_v9, 2  ;;  %v2325_v7 = vsel %vm581_vm0, %v2208_v32, %v2233_v57  ;;  %v2328_v10 = vsel %vm581_vm0, 0.0, %v600_v51  ;;  %1977 = vrot.lane.b32.xlu0 %v1976_v60, %s2132_s21  ;;  %v601_v14 = vrot.slane %v1911_v61, 7 }
  0xa0   :  { %v942_v12 = vsel %vm919_vm2, %v940_v62, %v941_v63  ;;  %v944_v15 = vsel %vm919_vm2, %v941_v63, %v943_v55  ;;  %v945_v18 = vrot.slane %v2242_v5, 2  ;;  %v604_v32 = vrot.slane %v1914_v59, 7  ;;  %v1934_v60 = vpop.trf.xlu1 }
  0xa1   :  { %v932_v16 = vsel %vm919_vm2, %v930_v2, %v931_v3  ;;  %v934_v17 = vsel %vm919_vm2, %v931_v3, %v933_v49  ;;  %v700_v57 = vsel %vm581_vm0, %v601_v14, 0.0  ;;  %v2013_v19 = vpack.i.bf16 %v944_v15, %v942_v12 }
  0xa2   :  { %2004 = vrot.lane.b32.xlu1 %v2003_v56, %s2132_s21  ;;  %v1981_v21 = vpack.i.bf16 %v934_v17, %v932_v16  ;;  %v603_v22 = vrot.slane %v1909_v1, 7  ;;  %v2339_v23 = vsel %vm581_vm0, %v600_v51, %v601_v14  ;;  %v776_v24 = vrot.slane %v700_v57, 1 }
  0xa3   :  { %v946_v25 = vrot.slane %v2325_v7, 2  ;;  %v935_v26 = vrot.slane %v2260_v11, 2  ;;  %v936_v27 = vrot.slane %v2276_v20, 2  ;;  %v1918_v37 = vunpack.i.l.bf16 %v2320_v4 }
  0xa4   :  { %1982 = vrot.lane.b32.xlu0 %v1981_v21, %s2133_s24  ;;  %v773_v38 = vrot.slane %v2328_v10, 1  ;;  %v2353_v40 = vsel %vm581_vm0, %v604_v32, 0.0  ;;  %v2358_v46 = vsel %vm581_vm0, 0.0, %v603_v22  ;;  %v2361_v47 = vsel %vm581_vm0, %v603_v22, %v604_v32 }
  0xa5   :  { %v947_v31 = vsel %vm919_vm2, %v945_v18, %v946_v25  ;;  %v949_v35 = vsel %vm919_vm2, %v946_v25, %v948_v43  ;;  %v937_v41 = vsel %vm919_vm2, %v935_v26, %v936_v27  ;;  %v939_v44 = vsel %vm919_vm2, %v936_v27, %v938_v0 }
  0xa6   :  { %2014 = vrot.lane.b32.xlu1 %v2013_v19, %s2133_s24  ;;  %v2018_v36 = vpack.i.bf16 %v949_v35, %v947_v31  ;;  %v1986_v43 = vpack.i.bf16 %v939_v44, %v937_v41  ;;  %v774_v48 = vrot.slane %v2339_v23, 1  ;;  %v606_v49 = vrot.slane %v1918_v37, 7 }
  0xa7   :  { %v1923_v50 = vunpack.i.l.bf16 %v2350_v39  ;;  %v781_v51 = vrot.slane %v2353_v40, 1  ;;  %v953_v52 = vrot.slane %v700_v57, 2  ;;  %v778_v58 = vrot.slane %v2358_v46, 1 }
  0xa8   :  { %1987 = vrot.lane.b32.xlu0 %v1986_v43, %s2133_s24  ;;  %v775_v53 = vsel %vm742_vm1, %v773_v38, %v774_v48  ;;  %v777_v54 = vsel %vm742_vm1, %v774_v48, %v776_v24  ;;  %v779_v59 = vrot.slane %v2361_v47, 1  ;;  %v950_v61 = vrot.slane %v2328_v10, 2  ;;  %v2390_v24 = vpop.trf.xlu1 }
  0xa9   :  { %v2023_v55 = vpack.i.bf16 %v777_v54, %v775_v53  ;;  %v607_v56 = vrot.slane %v1923_v50, 7  ;;  %v951_v62 = vrot.slane %v2339_v23, 2  ;;  %v2375_v63 = vsel %vm581_vm0, 0.0, %v606_v49 }
  0xaa   :  { %2019 = vrot.lane.b32.xlu1 %v2018_v36, %s2133_s24  ;;  %v780_v3 = vsel %vm742_vm1, %v778_v58, %v779_v59  ;;  %v782_v14 = vsel %vm742_vm1, %v779_v59, %v781_v51  ;;  %v1933_v17 = vunpack.i.h.bf16 %v1929_v30  ;;  %v1930_v32 = vunpack.i.l.bf16 %v1929_v30 }
  0xab   :  { %v702_v0 = vsel %vm581_vm0, %v607_v56, 0.0  ;;  %v2380_v1 = vsel %vm581_vm0, %v606_v49, %v607_v56  ;;  %v2028_v12 = vpack.i.bf16 %v782_v14, %v780_v3  ;;  %v952_v15 = vsel %vm919_vm2, %v950_v61, %v951_v62 }
  0xac   :  { %v786_v2 = vrot.slane %v702_v0, 1  ;;  %v954_v16 = vsel %vm919_vm2, %v951_v62, %v953_v52  ;;  %v963_v18 = vrot.slane %v702_v0, 2  ;;  %v2386_v57 = vrot.slane %v1933_v17, 7  ;;  %v2414_v52 = vpop.trf.xlu1 }
  0xad   :  { %v783_v19 = vrot.slane %v2375_v63, 1  ;;  %v784_v21 = vrot.slane %v2380_v1, 1  ;;  %v1938_v22 = vunpack.i.h.bf16 %v1934_v60  ;;  %v2033_v25 = vpack.i.bf16 %v954_v16, %v952_v15 }
  0xae   :  { %2024 = vrot.lane.b32.xlu1 %v2023_v55, %s2132_s21  ;;  %v1935_v26 = vunpack.i.l.bf16 %v1934_v60  ;;  %v612_v27 = vrot.slane %v1930_v32, 7  ;;  %v960_v38 = vrot.slane %v2375_v63, 2  ;;  %v961_v41 = vrot.slane %v2380_v1, 2 }
  0xaf   :  { %v785_v31 = vsel %vm742_vm1, %v783_v19, %v784_v21  ;;  %v787_v35 = vsel %vm742_vm1, %v784_v21, %v786_v2  ;;  %v2395_v37 = vrot.slane %v1938_v22, 7  ;;  %v1942_v54 = vunpack.i.l.bf16 %v2390_v24 }
  0xb0   :  { %v613_v30 = vrot.slane %v1935_v26, 7  ;;  %v2043_v44 = vpack.i.bf16 %v787_v35, %v785_v31  ;;  %v2407_v48 = vsel %vm581_vm0, 0.0, %v612_v27  ;;  %v962_v50 = vsel %vm919_vm2, %v960_v38, %v961_v41  ;;  %v36_v26 = vld [vmem:[%s2771_s0 + $0x3c] sm:$0xf] }
  0xb1   :  { %v2401_v36 = vsel %vm581_vm0, %v2386_v57, %v2395_v37  ;;  %v964_v51 = vsel %vm919_vm2, %v961_v41, %v963_v18  ;;  %v1947_v56 = vunpack.i.l.bf16 %v2414_v52  ;;  %v793_v58 = vrot.slane %v2407_v48, 1 }
  0xb2   :  { %2029 = vrot.lane.b32.xlu1 %v2028_v12, %s2132_s21  ;;  %v704_v43 = vsel %vm581_vm0, %v613_v30, 0.0  ;;  %v2410_v49 = vsel %vm581_vm0, %v612_v27, %v613_v30  ;;  %v2053_v55 = vpack.i.bf16 %v964_v51, %v962_v50  ;;  %v618_v61 = vrot.slane %v1942_v54, 7 }
  0xb3   :  { %v796_v53 = vrot.slane %v704_v43, 1  ;;  %v794_v59 = vrot.slane %v2410_v49, 1  ;;  %v973_v60 = vrot.slane %v704_v43, 2  ;;  %v970_v62 = vrot.slane %v2407_v48, 2 }
  0xb4   :  { %v971_v0 = vrot.slane %v2410_v49, 2  ;;  %v619_v2 = vrot.slane %v1947_v56, 7  ;;  %v2426_v12 = vsel %vm581_vm0, 0.0, %v618_v61  ;;  %v1242_v54 = vsel %vm919_vm2, %v2288_v28, 0 }
  0xb5   :  { %v795_v3 = vsel %vm742_vm1, %v793_v58, %v794_v59  ;;  %v797_v14 = vsel %vm742_vm1, %v794_v59, %v796_v53  ;;  %v803_v21 = vrot.slane %v2426_v12, 1  ;;  %v980_v38 = vrot.slane %v2426_v12, 2  ;;  %1809 = vmatpush3.bf16.msra.mxu0 %v1242_v54 }
  0xb6   :  { %2034 = vrot.lane.b32.xlu1 %v2033_v25, %s2133_s24  ;;  %v2430_v15 = vsel %vm581_vm0, %v618_v61, %v619_v2  ;;  %v706_v16 = vsel %vm581_vm0, %v619_v2, 0.0  ;;  %v2063_v17 = vpack.i.bf16 %v797_v14, %v795_v3  ;;  %v972_v32 = vsel %vm919_vm2, %v970_v62, %v971_v0  ;;  %v35_v25 = vld [vmem:[%s2771_s0 + $0x38] sm:$0xf] }
  0xb7   :  { %v806_v18 = vrot.slane %v706_v16, 1  ;;  %v974_v19 = vsel %vm919_vm2, %v971_v0, %v973_v60  ;;  %v804_v22 = vrot.slane %v2430_v15, 1  ;;  %v983_v27 = vrot.slane %v706_v16, 2 }
  0xb8   :  { %v2073_v31 = vpack.i.bf16 %v974_v19, %v972_v32  ;;  %v981_v41 = vrot.slane %v2430_v15, 2  ;;  %v1921_v56 = vunpack.i.h.bf16 %v2320_v4  ;;  %v771_v59 = vrot.slane %v2267_v13, 1 }
  0xb9   :  { %v805_v35 = vsel %vm742_vm1, %v803_v21, %v804_v22  ;;  %v807_v30 = vsel %vm742_vm1, %v804_v22, %v806_v18  ;;  %v768_v60 = vrot.slane %v2242_v5, 1  ;;  %v769_v61 = vrot.slane %v2325_v7, 1 }
  0xba   :  { %2044 = vrot.lane.b32.xlu1 %v2043_v44, %s2132_s21  ;;  %v1991_v44 = vpack.i.bf16 %v36_v26, %v35_v25  ;;  %v2083_v43 = vpack.i.bf16 %v807_v30, %v805_v35  ;;  %v982_v50 = vsel %vm919_vm2, %v980_v38, %v981_v41  ;;  %v984_v51 = vsel %vm919_vm2, %v981_v41, %v983_v27 }
  0xbb   :  { %v2093_v53 = vpack.i.bf16 %v984_v51, %v982_v50  ;;  %v609_v62 = vrot.slane %v1921_v56, 7  ;;  %v958_v0 = vrot.slane %v2353_v40, 2  ;;  %v770_v28 = vsel %vm742_vm1, %v768_v60, %v769_v61 }
  0xbc   :  { %v772_v3 = vsel %vm742_vm1, %v769_v61, %v771_v59  ;;  %v956_v4 = vrot.slane %v2361_v47, 2  ;;  %v705_v22 = vsel %vm581_vm0, %v2395_v37, 0.0  ;;  %v1950_v25 = vunpack.i.h.bf16 %v2414_v52 }
  0xbd   :  { %v2467_v14 = vsel %vm581_vm0, 0.0, %v609_v62  ;;  %v2486_v38 = vsel %vm581_vm0, 0.0, %v2386_v57  ;;  %v1945_v41 = vunpack.i.h.bf16 %v2390_v24  ;;  %v801_v37 = vrot.slane %v705_v22, 1 }
  0xbe   :  { %2054 = vrot.lane.b32.xlu1 %v2053_v55, %s2133_s24  ;;  %v1926_v55 = vunpack.i.h.bf16 %v2350_v39  ;;  %v955_v39 = vrot.slane %v2358_v46, 2  ;;  %v959_v18 = vsel %vm919_vm2, %v956_v4, %v958_v0  ;;  %v788_v32 = vrot.slane %v2467_v14, 1 }
  0xbf   :  { %v965_v35 = vrot.slane %v2467_v14, 2  ;;  %v798_v51 = vrot.slane %v2486_v38, 1  ;;  %v621_v54 = vrot.slane %v1945_v41, 7  ;;  %v975_v59 = vrot.slane %v2486_v38, 2 }
  0xc0   :  { %v610_v58 = vrot.slane %v1926_v55, 7  ;;  %v957_v40 = vsel %vm919_vm2, %v955_v39, %v956_v4  ;;  %v978_v55 = vrot.slane %v705_v22, 2  ;;  %v976_v60 = vrot.slane %v2401_v36, 2 }
  0xc1   :  { %v2038_v26 = vpack.i.bf16 %v959_v18, %v957_v40  ;;  %v2501_v61 = vsel %vm581_vm0, 0.0, %v621_v54 }
  0xc2   :  { %2064 = vrot.lane.b32.xlu1 %v2063_v17, %s2132_s21  ;;  %v703_v2 = vsel %vm581_vm0, %v610_v58, 0.0  ;;  %v2470_v13 = vsel %vm581_vm0, %v609_v62, %v610_v58  ;;  %v2008_v17 = vpack.i.bf16 %v772_v3, %v770_v28  ;;  %v977_v28 = vsel %vm919_vm2, %v975_v59, %v976_v60 }
  0xc3   :  { %v791_v16 = vrot.slane %v703_v2, 1  ;;  %v789_v19 = vrot.slane %v2470_v13, 1  ;;  %v968_v21 = vrot.slane %v703_v2, 2  ;;  %v966_v30 = vrot.slane %v2470_v13, 2 }
  0xc4   :  { %v979_v3 = vsel %vm919_vm2, %v976_v60, %v978_v55  ;;  %v808_v39 = vrot.slane %v2501_v61, 1 }
  0xc5   :  { %v790_v27 = vsel %vm742_vm1, %v788_v32, %v789_v19  ;;  %v969_v50 = vsel %vm919_vm2, %v966_v30, %v968_v21 }
  0xc6   :  { %2074 = vrot.lane.b32.xlu1 %v2073_v31, %s2133_s24  ;;  %1992 = vxpose.xlu0.b32.start.end [1/1] (short) (narrow) %v1991_v44, 16  ;;  %v792_v31 = vsel %vm742_vm1, %v789_v19, %v791_v16  ;;  %v622_v44 = vrot.slane %v1950_v25, 7  ;;  %v985_v19 = vrot.slane %v2501_v61, 2 }
  0xc7   :  { %v2048_v52 = vpack.i.bf16 %v792_v31, %v790_v27 }
  0xc8   :  { %v707_v57 = vsel %vm581_vm0, %v622_v44, 0.0  ;;  %v2504_v62 = vsel %vm581_vm0, %v621_v54, %v622_v44 }
  0xc9   :  { %v811_v0 = vrot.slane %v707_v57, 1  ;;  %v809_v4 = vrot.slane %v2504_v62, 1  ;;  %v988_v16 = vrot.slane %v707_v57, 2  ;;  %v986_v21 = vrot.slane %v2504_v62, 2 }
  0xca   :  { %2084 = vrot.lane.b32.xlu1 %v2083_v43, %s2132_s21  ;;  %v967_v43 = vsel %vm919_vm2, %v965_v35, %v966_v30 }
  0xcb   :  { %v2058_v24 = vpack.i.bf16 %v969_v50, %v967_v43  ;;  %v810_v18 = vsel %vm742_vm1, %v808_v39, %v809_v4  ;;  %v812_v32 = vsel %vm742_vm1, %v809_v4, %v811_v0  ;;  %v987_v31 = vsel %vm919_vm2, %v985_v19, %v986_v21 }
  0xcc   :  { %v2088_v25 = vpack.i.bf16 %v812_v32, %v810_v18  ;;  %v989_v35 = vsel %vm919_vm2, %v986_v21, %v988_v16 }
  0xcd   :  { %v2098_v44 = vpack.i.bf16 %v989_v35, %v987_v31 }
  0xce   :  { %2094 = vrot.lane.b32.xlu1 %v2093_v53, %s2133_s24  ;;  %v799_v53 = vrot.slane %v2401_v36, 1 }
  0xd0   :  { %v800_v56 = vsel %vm742_vm1, %v798_v51, %v799_v53  ;;  %v802_v58 = vsel %vm742_vm1, %v799_v53, %v801_v37 }
  0xd1   :  { %v2068_v2 = vpack.i.bf16 %v802_v58, %v800_v56 }
  0xf3   :  { %2009 = vrot.lane.b32.xlu0 %v2008_v17, %s2132_s21  ;;  %v2078_v17 = vpack.i.bf16 %v979_v3, %v977_v28 }
  0xf7   :  { %2039 = vrot.lane.b32.xlu0 %v2038_v26, %s2133_s24 }
  0xfb   :  { %2049 = vrot.lane.b32.xlu0 %v2048_v52, %s2132_s21 }
  0xff   :  { %2059 = vrot.lane.b32.xlu0 %v2058_v24, %s2133_s24 }
 0x103   :  { %2069 = vrot.lane.b32.xlu0 %v2068_v2, %s2132_s21 }
 0x105   :  { %v1958_v40 = vpop.permute.xlu1 %1957 }
 0x106   :  { %v1960_v52 = vunpack.i.h.bf16 %v1958_v40  ;;  %v1959_v43 = vunpack.i.l.bf16 %v1958_v40 }
 0x107   :  { %v1953_v22 = vpop.permute.xlu0 %1952  ;;  %2079 = vrot.lane.b32.xlu0 %v2078_v17, %s2133_s24 }
 0x108   :  { %v1955_v26 = vunpack.i.h.bf16 %v1953_v22  ;;  %v1954_v27 = vunpack.i.l.bf16 %v1953_v22  ;;  %v1100_v59 = vsel %vm1096_vm3, %v2222_v42, %v1960_v52 }
 0x10a   :  { %v1097_v51 = vsel %vm1096_vm3, %v2214_v34, %v1954_v27  ;;  %v1098_v53 = vsel %vm1096_vm3, %v2226_v45, %v1955_v26  ;;  %v1099_v34 = vsel %vm1096_vm3, %v2211_v33, %v1959_v43 }
 0x10b   :  { %2089 = vrot.lane.b32.xlu0 %v2088_v25, %s2132_s21 }
 0x10c   :  { %v1963_v30 = vpop.permute.xlu1 %1962 }
 0x10d   :  { %v1965_v41 = vunpack.i.h.bf16 %v1963_v30  ;;  %v1964_v37 = vunpack.i.l.bf16 %v1963_v30  ;;  %v1973_v50 = vpop.permute.xlu0 %1972 }
 0x10e   :  { %v1975_v28 = vunpack.i.h.bf16 %v1973_v50  ;;  %v1974_v3 = vunpack.i.l.bf16 %v1973_v50 }
 0x10f   :  { %v1130_v54 = vsel %vm1129_vm4, %v1097_v51, %v1964_v37  ;;  %v1131_v55 = vsel %vm1129_vm4, %v1098_v53, %v1965_v41  ;;  %2099 = vrot.lane.b32.xlu0 %v2098_v44, %s2133_s24 }
 0x110   :  { %v1968_v57 = vpop.permute.xlu1 %1967  ;;  %v1162_v24 = vpack.c.bf16 %v1131_v55, %v1130_v54  ;;  %v1102_v42 = vsel %vm1096_vm3, %v2253_v9, %v1975_v28  ;;  %v1101_v33 = vsel %vm1096_vm3, %v2250_v8, %v1974_v3 }
 0x111   :  { %v1970_v56 = vunpack.i.h.bf16 %v1968_v57  ;;  %v1969_v58 = vunpack.i.l.bf16 %v1968_v57  ;;  %v1978_v0 = vpop.permute.xlu0 %1977 }
 0x112   :  { %1810 = vmatprep.mubr.msk.bf16.mxu0 %vm1192_vm5, %v1162_v24  ;;  %v1980_v26 = vunpack.i.h.bf16 %v1978_v0  ;;  %v1979_v27 = vunpack.i.l.bf16 %v1978_v0 }
 0x113   :  { %v1133_v45 = vsel %vm1129_vm4, %v1100_v59, %v1970_v56  ;;  %v1132_v60 = vsel %vm1129_vm4, %v1099_v34, %v1969_v58 }
 0x114   :  { %v1163_v2 = vpack.c.bf16 %v1133_v45, %v1132_v60  ;;  %v2005_v39 = vpop.permute.xlu1 %2004 }
 0x115   :  { %v2007_v4 = vunpack.i.h.bf16 %v2005_v39  ;;  %v2006_v16 = vunpack.i.l.bf16 %v2005_v39 }
 0x116   :  { %1811 = vmatmul.mubr.msk.bf16.vlgmr.msra.gmra.mrb[0].mxu0 %vm1192_vm5, %v1163_v2  ;;  %v1983_v17 = vpop.permute.xlu0 %1982 }
 0x117   :  { %v1985_v18 = vunpack.i.h.bf16 %v1983_v17  ;;  %v1984_v32 = vunpack.i.l.bf16 %v1983_v17  ;;  %v1106_v19 = vsel %vm1096_vm3, %v2292_v29, %v2007_v4  ;;  %v1105_v21 = vsel %vm1096_vm3, %v2246_v6, %v2006_v16 }
 0x118   :  { %v2015_v40 = vpop.permute.xlu1 %2014  ;;  %v1104_v6 = vsel %vm1096_vm3, %v2276_v20, %v1980_v26  ;;  %v1103_v29 = vsel %vm1096_vm3, %v2260_v11, %v1979_v27 }
 0x119   :  { %v2017_v22 = vunpack.i.h.bf16 %v2015_v40  ;;  %v2016_v25 = vunpack.i.l.bf16 %v2015_v40  ;;  %v1134_v31 = vsel %vm1129_vm4, %v1101_v33, %v1984_v32  ;;  %v1135_v9 = vsel %vm1129_vm4, %v1102_v42, %v1985_v18 }
 0x11a   :  { %v1164_v35 = vpack.c.bf16 %v1135_v9, %v1134_v31  ;;  %v1988_v41 = vpop.permute.xlu0 %1987 }
 0x11b   :  { %v1138_v8 = vsel %vm1129_vm4, %v1105_v21, %v2016_v25  ;;  %v1139_v30 = vsel %vm1129_vm4, %v1106_v19, %v2017_v22  ;;  %v1990_v37 = vunpack.i.h.bf16 %v1988_v41  ;;  %v1989_v44 = vunpack.i.l.bf16 %v1988_v41 }
 0x11c   :  { %1814 = vmatprep.mubr.msk.bf16.mxu0 %vm1192_vm5, %v1164_v35  ;;  %v1166_v52 = vpack.c.bf16 %v1139_v30, %v1138_v8  ;;  %v2556_v53 = vpop.permute.xlu1 %2019 }
 0x11d   :  { %v1136_v43 = vsel %vm1129_vm4, %v1103_v29, %v1989_v44  ;;  %v1137_v50 = vsel %vm1129_vm4, %v1104_v6, %v1990_v37 }
 0x11e   :  { %v1165_v51 = vpack.c.bf16 %v1137_v50, %v1136_v43 }
 0x120   :  { %1815 = vmatmul.mubr.msk.bf16.gmra.mrb[4].mxu0 %vm1192_vm5, %v1165_v51  ;;  %v2025_v58 = vpop.permute.xlu1 %2024 }
 0x121   :  { %1818 = vmatprep.mubr.msk.bf16.mxu0 %vm1192_vm5, %v1166_v52  ;;  %v2027_v51 = vunpack.i.h.bf16 %v2025_v58 }
 0x124   :  { %v2574_v33 = vpop.permute.xlu1 %2029 }
 0x128   :  { %v2035_v29 = vpop.permute.xlu1 %2034 }
 0x12c   :  { %v2045_v50 = vpop.permute.xlu1 %2044 }
 0x146   :  { %v1993_v54 = vpop.trf.xlu0 }
 0x147   :  { %v1997_v55 = vunpack.i.h.bf16 %v1993_v54  ;;  %v1994_v57 = vunpack.i.l.bf16 %v1993_v54  ;;  %v2026_v54 = vunpack.i.l.bf16 %v2025_v58 }
 0x149   :  { %v627_v24 = vrot.slane %v1997_v55, 7  ;;  %v624_v20 = vrot.slane %v1994_v57, 7  ;;  %v2055_v55 = vpop.permute.xlu1 %2054  ;;  %v2037_v57 = vunpack.i.h.bf16 %v2035_v29 }
 0x14a   :  { %v1998_v56 = vpop.trf.xlu0 }
 0x14b   :  { %v2002_v11 = vunpack.i.h.bf16 %v1998_v56  ;;  %v2559_v59 = vsel %vm581_vm0, 0.0, %v627_v24  ;;  %v2562_v34 = vsel %vm581_vm0, 0.0, %v624_v20  ;;  %v1999_v45 = vunpack.i.l.bf16 %v1998_v56 }
 0x14c   :  { %v818_v3 = vrot.slane %v2559_v59, 1  ;;  %v813_v39 = vrot.slane %v2562_v34, 1  ;;  %v995_v21 = vrot.slane %v2559_v59, 2  ;;  %v990_v25 = vrot.slane %v2562_v34, 2 }
 0x14d   :  { %v628_v60 = vrot.slane %v2002_v11, 7  ;;  %v625_v0 = vrot.slane %v1999_v45, 7  ;;  %v2021_v56 = vunpack.i.l.bf16 %v2556_v53  ;;  %v1110_v11 = vsel %vm1096_vm3, %v2339_v23, %v2027_v51 }
 0x14e   :  { %v1109_v45 = vsel %vm1096_vm3, %v2328_v10, %v2026_v54  ;;  %v1143_v58 = vsel %vm1129_vm4, %v1110_v11, %v2037_v57 }
 0x14f   :  { %v709_v2 = vsel %vm581_vm0, %v628_v60, 0.0  ;;  %v2566_v28 = vsel %vm581_vm0, %v627_v24, %v628_v60  ;;  %v2571_v17 = vsel %vm581_vm0, %v624_v20, %v625_v0  ;;  %v708_v42 = vsel %vm581_vm0, %v625_v0, 0.0 }
 0x150   :  { %v821_v4 = vrot.slane %v709_v2, 1  ;;  %v998_v16 = vrot.slane %v709_v2, 2  ;;  %v816_v40 = vrot.slane %v708_v42, 1  ;;  %v993_v18 = vrot.slane %v708_v42, 2 }
 0x151   :  { %v819_v32 = vrot.slane %v2566_v28, 1  ;;  %v814_v19 = vrot.slane %v2571_v17, 1  ;;  %v996_v22 = vrot.slane %v2566_v28, 2  ;;  %v991_v26 = vrot.slane %v2571_v17, 2 }
 0x152   :  { %v2036_v24 = vunpack.i.l.bf16 %v2035_v29  ;;  %v2022_v20 = vunpack.i.h.bf16 %v2556_v53  ;;  %v2046_v42 = vunpack.i.l.bf16 %v2045_v50 }
 0x153   :  { %v820_v27 = vsel %vm742_vm1, %v818_v3, %v819_v32  ;;  %v822_v31 = vsel %vm742_vm1, %v819_v32, %v821_v4  ;;  %v815_v9 = vsel %vm742_vm1, %v813_v39, %v814_v19  ;;  %v817_v35 = vsel %vm742_vm1, %v814_v19, %v816_v40  ;;  %v2065_v3 = vpop.permute.xlu1 %2064 }
 0x154   :  { %v2108_v8 = vpack.i.bf16 %v822_v31, %v820_v27  ;;  %v2103_v30 = vpack.i.bf16 %v817_v35, %v815_v9  ;;  %v997_v41 = vsel %vm919_vm2, %v995_v21, %v996_v22  ;;  %v999_v37 = vsel %vm919_vm2, %v996_v22, %v998_v16 }
 0x155   :  { %v992_v44 = vsel %vm919_vm2, %v990_v25, %v991_v26  ;;  %v994_v6 = vsel %vm919_vm2, %v991_v26, %v993_v18  ;;  %v2118_v52 = vpack.i.bf16 %v999_v37, %v997_v41  ;;  %v1142_v39 = vsel %vm1129_vm4, %v1109_v45, %v2036_v24 }
 0x156   :  { %2109 = vrot.lane.b32.xlu0 %v2108_v8, %s2132_s21  ;;  %2104 = vrot.lane.b32.xlu1 %v2103_v30, %s2132_s21  ;;  %v2113_v43 = vpack.i.bf16 %v994_v6, %v992_v44  ;;  %v2047_v16 = vunpack.i.h.bf16 %v2045_v50  ;;  %v2032_v18 = vunpack.i.h.bf16 %v2574_v33  ;;  %v2031_v32 = vunpack.i.l.bf16 %v2574_v33 }
 0x157   :  { %v1168_v21 = vpack.c.bf16 %v1143_v58, %v1142_v39  ;;  %v2057_v26 = vunpack.i.h.bf16 %v2055_v55  ;;  %v1113_v27 = vsel %vm1096_vm3, %v2375_v63, %v2046_v42  ;;  %v2075_v31 = vpop.permute.xlu1 %2074  ;;  %v2067_v37 = vunpack.i.h.bf16 %v2065_v3 }
 0x158   :  { %v1112_v33 = vsel %vm1096_vm3, %v2361_v47, %v2032_v18  ;;  %v1111_v35 = vsel %vm1096_vm3, %v2358_v46, %v2031_v32  ;;  %v2066_v63 = vunpack.i.l.bf16 %v2065_v3  ;;  %v2077_v54 = vunpack.i.h.bf16 %v2075_v31 }
 0x159   :  { %v2076_v46 = vunpack.i.l.bf16 %v2075_v31 }
 0x15a   :  { %2119 = vrot.lane.b32.xlu0 %v2118_v52, %s2133_s24  ;;  %2114 = vrot.lane.b32.xlu1 %v2113_v43, %s2133_s24  ;;  %v1117_v57 = vsel %vm1096_vm3, %v2407_v48, %v2066_v63 }
 0x15b   :  { %v2085_v50 = vpop.permute.xlu1 %2084 }
 0x15f   :  { %v2095_v48 = vpop.permute.xlu1 %2094 }
 0x160   :  { %v2097_v42 = vunpack.i.h.bf16 %v2095_v48 }
 0x165   :  { %v2010_v60 = vpop.permute.xlu0 %2009 }
 0x166   :  { %v2012_v0 = vunpack.i.h.bf16 %v2010_v60  ;;  %v2011_v2 = vunpack.i.l.bf16 %v2010_v60  ;;  %v1150_v60 = vsel %vm1129_vm4, %v1117_v57, %v2076_v46 }
 0x168   :  { %v1108_v4 = vsel %vm1096_vm3, %v2325_v7, %v2012_v0  ;;  %v1107_v53 = vsel %vm1096_vm3, %v2242_v5, %v2011_v2  ;;  %v2056_v7 = vunpack.i.l.bf16 %v2055_v55  ;;  %v1114_v5 = vsel %vm1096_vm3, %v2380_v1, %v2047_v16 }
 0x169   :  { %v2040_v23 = vpop.permute.xlu0 %2039  ;;  %v1140_v40 = vsel %vm1129_vm4, %v1107_v53, %v2021_v56  ;;  %v1141_v10 = vsel %vm1129_vm4, %v1108_v4, %v2022_v20  ;;  %v1147_v1 = vsel %vm1129_vm4, %v1114_v5, %v2057_v26  ;;  %v1118_v55 = vsel %vm1096_vm3, %v2410_v49, %v2067_v37 }
 0x16a   :  { %v1167_v19 = vpack.c.bf16 %v1141_v10, %v1140_v40  ;;  %v2042_v22 = vunpack.i.h.bf16 %v2040_v23  ;;  %v2041_v25 = vunpack.i.l.bf16 %v2040_v23  ;;  %v1146_v41 = vsel %vm1129_vm4, %v1113_v27, %v2056_v7 }
 0x16b   :  { %v1170_v43 = vpack.c.bf16 %v1147_v1, %v1146_v41  ;;  %v1151_v49 = vsel %vm1129_vm4, %v1118_v55, %v2077_v54  ;;  %v2087_v0 = vunpack.i.h.bf16 %v2085_v50  ;;  %v2086_v2 = vunpack.i.l.bf16 %v2085_v50 }
 0x16c   :  { %1819 = vmatmul.mubr.msk.bf16.gmra.mrb[8].mxu0 %vm1192_vm5, %v1167_v19  ;;  %v1145_v8 = vsel %vm1129_vm4, %v1112_v33, %v2042_v22  ;;  %v1144_v30 = vsel %vm1129_vm4, %v1111_v35, %v2041_v25  ;;  %v1172_v53 = vpack.c.bf16 %v1151_v49, %v1150_v60 }
 0x16d   :  { %v2050_v9 = vpop.permute.xlu0 %2049  ;;  %1822 = vmatprep.mubr.msk.bf16.mxu0 %vm1192_vm5, %v1168_v21  ;;  %v1169_v6 = vpack.c.bf16 %v1145_v8, %v1144_v30  ;;  %v1122_v23 = vsel %vm1096_vm3, %v2430_v15, %v2087_v0  ;;  %v1121_v40 = vsel %vm1096_vm3, %v2426_v12, %v2086_v2 }
 0x16e   :  { %v2052_v29 = vunpack.i.h.bf16 %v2050_v9  ;;  %v2051_v52 = vunpack.i.l.bf16 %v2050_v9  ;;  %v1155_v15 = vsel %vm1129_vm4, %v1122_v23, %v2097_v42 }
 0x170   :  { %v1116_v20 = vsel %vm1096_vm3, %v2470_v13, %v2052_v29  ;;  %v1115_v56 = vsel %vm1096_vm3, %v2467_v14, %v2051_v52  ;;  %v2096_v14 = vunpack.i.l.bf16 %v2095_v48 }
 0x171   :  { %v2060_v44 = vpop.permute.xlu0 %2059 }
 0x172   :  { %v2062_v47 = vunpack.i.h.bf16 %v2060_v44  ;;  %v2061_v51 = vunpack.i.l.bf16 %v2060_v44  ;;  %v1154_v22 = vsel %vm1129_vm4, %v1121_v40, %v2096_v14 }
 0x173   :  { %v1174_v5 = vpack.c.bf16 %v1155_v15, %v1154_v22 }
 0x174   :  { %1823 = vmatmul.mubr.msk.bf16.gmra.mrb[12].mxu0 %vm1192_vm5, %v1169_v6  ;;  %v1148_v11 = vsel %vm1129_vm4, %v1115_v56, %v2061_v51  ;;  %v1149_v45 = vsel %vm1129_vm4, %v1116_v20, %v2062_v47 }
 0x175   :  { %v2070_v24 = vpop.permute.xlu0 %2069  ;;  %1826 = vmatprep.mubr.msk.bf16.mxu0 %vm1192_vm5, %v1170_v43  ;;  %v1171_v39 = vpack.c.bf16 %v1149_v45, %v1148_v11 }
 0x176   :  { %v2072_v58 = vunpack.i.h.bf16 %v2070_v24  ;;  %v2071_v4 = vunpack.i.l.bf16 %v2070_v24 }
 0x178   :  { %v1120_v18 = vsel %vm1096_vm3, %v2401_v36, %v2072_v58  ;;  %v1119_v32 = vsel %vm1096_vm3, %v2486_v38, %v2071_v4 }
 0x179   :  { %v2080_v3 = vpop.permute.xlu0 %2079 }
 0x17a   :  { %v2082_v13 = vunpack.i.h.bf16 %v2080_v3  ;;  %v2081_v16 = vunpack.i.l.bf16 %v2080_v3 }
 0x17c   :  { %1827 = vmatmul.mubr.msk.bf16.gmra.mrb[16].mxu0 %vm1192_vm5, %v1171_v39  ;;  %v1152_v19 = vsel %vm1129_vm4, %v1119_v32, %v2081_v16  ;;  %v1153_v21 = vsel %vm1129_vm4, %v1120_v18, %v2082_v13 }
 0x17d   :  { %v2090_v10 = vpop.permute.xlu0 %2089  ;;  %1830 = vmatprep.mubr.msk.bf16.mxu0 %vm1192_vm5, %v1172_v53  ;;  %v1173_v26 = vpack.c.bf16 %v1153_v21, %v1152_v19 }
 0x17e   :  { %v2092_v12 = vunpack.i.h.bf16 %v2090_v10  ;;  %v2091_v7 = vunpack.i.l.bf16 %v2090_v10 }
 0x180   :  { %v1124_v36 = vsel %vm1096_vm3, %v2504_v62, %v2092_v12  ;;  %v1123_v38 = vsel %vm1096_vm3, %v2501_v61, %v2091_v7 }
 0x181   :  { %v2100_v25 = vpop.permute.xlu0 %2099 }
 0x182   :  { %v2102_v27 = vunpack.i.h.bf16 %v2100_v25  ;;  %v2101_v31 = vunpack.i.l.bf16 %v2100_v25 }
 0x184   :  { %1831 = vmatmul.mubr.msk.bf16.gmra.mrb[20].mxu0 %vm1192_vm5, %v1173_v26  ;;  %v1156_v9 = vsel %vm1129_vm4, %v1123_v38, %v2101_v31  ;;  %v1157_v33 = vsel %vm1129_vm4, %v1124_v36, %v2102_v27  ;;  %v2124_v38 = vld [vmem:[%s2774_s3] sm:$0xff]  }
 0x185   :  { %1834 = vmatprep.mubr.msk.bf16.mxu0 %vm1192_vm5, %v1174_v5  ;;  %v1175_v35 = vpack.c.bf16 %v1157_v33, %v1156_v9  ;;  %v2134_v5 = vmov 0.0  }
 0x186   :  { %1842 = vmatprep.subr.bf16.mxu1 %v2134_v5  ;;  %1858 = vmatprep.mubr.msk.bf16.mxu1 %vm2135_vm9, %v2134_v5 }
 0x187   :  { %1843 = vmatpush3.bf16.msra.mxu1 %v2124_v38 }
 0x188   :  { %1844 = vmatprep.subr.bf16.mxu1 %v2134_v5 }
 0x18c   :  { %1835 = vmatmul.mubr.msk.bf16.gmra.mrb[24].mxu0 %vm1192_vm5, %v1175_v35 }
 0x1c8   :  { %v2110_v8 = vpop.permute.xlu0 %2109  ;;  %v2105_v30 = vpop.permute.xlu1 %2104 }
 0x1c9   :  { %v2112_v41 = vunpack.i.h.bf16 %v2110_v8  ;;  %v2111_v1 = vunpack.i.l.bf16 %v2110_v8  ;;  %v2107_v37 = vunpack.i.h.bf16 %v2105_v30  ;;  %v2106_v63 = vunpack.i.l.bf16 %v2105_v30 }
 0x1cb   :  { %v1128_v61 = vsel %vm1096_vm3, %v2566_v28, %v2112_v41  ;;  %v1127_v50 = vsel %vm1096_vm3, %v2559_v59, %v2111_v1  ;;  %v1126_v47 = vsel %vm1096_vm3, %v2571_v17, %v2107_v37  ;;  %v1125_v51 = vsel %vm1096_vm3, %v2562_v34, %v2106_v63  ;;  %v2678_v59 = vld [vmem:[%s2773_s2] ss:$0 sm:$0xff] }
 0x1cc   :  { %v2120_v44 = vpop.permute.xlu0 %2119  ;;  %v2115_v6 = vpop.permute.xlu1 %2114 }
 0x1cd   :  { %v2122_v29 = vunpack.i.h.bf16 %v2120_v44  ;;  %v2121_v62 = vunpack.i.l.bf16 %v2120_v44  ;;  %v2117_v52 = vunpack.i.h.bf16 %v2115_v6  ;;  %v2116_v43 = vunpack.i.l.bf16 %v2115_v6 }
 0x1cf   :  { %v1160_v54 = vsel %vm1129_vm4, %v1127_v50, %v2121_v62  ;;  %v1161_v46 = vsel %vm1129_vm4, %v1128_v61, %v2122_v29  ;;  %v1158_v55 = vsel %vm1129_vm4, %v1125_v51, %v2116_v43  ;;  %v1159_v57 = vsel %vm1129_vm4, %v1126_v47, %v2117_v52 }
 0x1d0   :  { %v1177_v24 = vpack.c.bf16 %v1161_v46, %v1160_v54  ;;  %v1176_v20 = vpack.c.bf16 %v1159_v57, %v1158_v55 }
 0x1d2   :  { %1838 = vmatprep.mubr.msk.bf16.mxu0 %vm1192_vm5, %v1176_v20 }
 0x1d3   :  { %1839 = vmatmul.mubr.msk.bf16.gmra.mrb[28].mxu0 %vm1192_vm5, %v1177_v24 }
 0x1e9   :  { %v1812_v34 = vpop.f32.mrb[0].mxu0 }
 0x1ea   :  { %v1287_v28 = vadd.f32 %v1812_v34, %v2678_v59  ;;  %v1278_v17 = vpop.f32.mrb[1].mxu0 }
 0x1eb   :  { %v1279_v56 = vadd.f32 %v2678_v59, %v1278_v17  ;;  %v1813_v11 = vpop.f32.mrb[2].mxu0  ;;  %v2125_v17 = vld [vmem:[%s2774_s3 + $0x8] sm:$0xff]  }
 0x1ec   :  { %v1290_v45 = vadd.f32 %v1813_v11, %v2678_v59  ;;  %v1281_v60 = vpop.f32.mrb[3].mxu0  ;;  %v1407_v0 = vmax.f32 %v1287_v28, 0.0  ;;  %1845 = vmatpush3.bf16.msra.mxu1 %v2125_v17  ;;  %v2127_v11 = vld [vmem:[%s2774_s3 + $0x18] sm:$0xff]  }
 0x1ed   :  { %v1282_v49 = vadd.f32 %v2678_v59, %v1281_v60  ;;  %v1405_v48 = vmax.f32 %v1279_v56, 0.0  ;;  %1846 = vmatprep.subr.bf16.mxu1 %v2134_v5  ;;  %v2126_v56 = vld [vmem:[%s2774_s3 + $0x10] sm:$0xff]   ;;  %v2128_v60 = vld [vmem:[%s2774_s3 + $0x20] sm:$0xff]  }
 0x1ee   :  { %v1408_v2 = vmax.f32 %v1290_v45, 0.0 }
 0x1ef   :  { %v1406_v3 = vmax.f32 %v1282_v49, 0.0 }
 0x1f0   :  { %v1444_v39 = vadd.f32 %v1408_v2, %v1407_v0  ;;  %1847 = vmatpush3.bf16.msra.mxu1 %v2126_v56 }
 0x1f1   :  { %v1437_v58 = vadd.f32 %v1406_v3, %v1405_v48  ;;  %1848 = vmatprep.subr.bf16.mxu1 %v2134_v5 }
 0x1f2   :  { %v1445_v4 = vrot.slane %v1444_v39, 4 }
 0x1f3   :  { %v1438_v53 = vrot.slane %v1437_v58, 4  ;;  %v1816_v42 = vpop.f32.mrb[4].mxu0 }
 0x1f4   :  { %v1446_v13 = vadd.f32 %v1445_v4, %v1444_v39  ;;  %v1303_v23 = vadd.f32 %v1816_v42, %v2678_v59  ;;  %v1294_v40 = vpop.f32.mrb[5].mxu0  ;;  %1849 = vmatpush3.bf16.msra.mxu1 %v2127_v11  ;;  %v2129_v4 = vld [vmem:[%s2774_s3 + $0x28] sm:$0xff]  }
 0x1f5   :  { %v1439_v16 = vadd.f32 %v1438_v53, %v1437_v58  ;;  %v1295_v18 = vadd.f32 %v2678_v59, %v1294_v40  ;;  %v1817_v32 = vpop.f32.mrb[6].mxu0  ;;  %1850 = vmatprep.subr.bf16.mxu1 %v2134_v5 }
 0x1f6   :  { %v1447_v14 = vrot.slane %v1446_v13, 2  ;;  %v1306_v21 = vadd.f32 %v1817_v32, %v2678_v59  ;;  %v1297_v22 = vpop.f32.mrb[7].mxu0  ;;  %v1411_v25 = vmax.f32 %v1303_v23, 0.0 }
 0x1f7   :  { %v1440_v10 = vrot.slane %v1439_v16, 2  ;;  %v1298_v26 = vadd.f32 %v2678_v59, %v1297_v22  ;;  %v1409_v31 = vmax.f32 %v1295_v18, 0.0 }
 0x1f8   :  { %v1448_v19 = vadd.f32 %v1447_v14, %v1446_v13  ;;  %v1412_v7 = vmax.f32 %v1306_v21, 0.0  ;;  %1851 = vmatpush3.bf16.msra.mxu1 %v2128_v60 }
 0x1f9   :  { %v1441_v15 = vadd.f32 %v1440_v10, %v1439_v16  ;;  %v1410_v36 = vmax.f32 %v1298_v26, 0.0  ;;  %1852 = vmatprep.subr.bf16.mxu1 %v2134_v5  ;;  %v2130_v10 = vld [vmem:[%s2774_s3 + $0x30] sm:$0xff]  }
 0x1fa   :  { %v1449_v12 = vrot.slane %v1448_v19, 1  ;;  %v1458_v33 = vadd.f32 %v1412_v7, %v1411_v25 }
 0x1fb   :  { %v1442_v27 = vrot.slane %v1441_v15, 1  ;;  %v1451_v8 = vadd.f32 %v1410_v36, %v1409_v31  ;;  %v2131_v31 = vld [vmem:[%s2774_s3 + $0x38] sm:$0xff]  }
 0x1fc   :  { %v1450_v9 = vadd.f32 %v1449_v12, %v1448_v19  ;;  %v1459_v41 = vrot.slane %v1458_v33, 4  ;;  %1853 = vmatpush3.bf16.msra.mxu1 %v2129_v4 }
 0x1fd   :  { %v1443_v35 = vadd.f32 %v1442_v27, %v1441_v15  ;;  %v1452_v37 = vrot.slane %v1451_v8, 4  ;;  %1854 = vmatprep.subr.bf16.mxu1 %v2134_v5 }
 0x1fe   :  { %v1550_v30 = vpack.c.bf16 %v1450_v9, %v1450_v9  ;;  %v1460_v44 = vadd.f32 %v1459_v41, %v1458_v33 }
 0x1ff   :  { %v1549_v1 = vpack.c.bf16 %v1443_v35, %v1443_v35  ;;  %v1453_v29 = vadd.f32 %v1452_v37, %v1451_v8 }
 0x200   :  { %v1605_v63 = vunpack.c.l.b16 %v1550_v30  ;;  %v1461_v62 = vrot.slane %v1460_v44, 2  ;;  %1855 = vmatpush3.bf16.msra.mxu1 %v2130_v10 }
 0x201   :  { %v1604_v6 = vunpack.c.l.b16 %v1549_v1  ;;  %v1454_v43 = vrot.slane %v1453_v29, 2  ;;  %1856 = vmatprep.subr.bf16.mxu1 %v2134_v5 }
 0x202   :  { %v1462_v61 = vadd.f32 %v1461_v62, %v1460_v44 }
 0x203   :  { %v1621_v52 = vsel %vm1620_vm6, %v1605_v63, %v1604_v6  ;;  %v1455_v50 = vadd.f32 %v1454_v43, %v1453_v29 }
 0x204   :  { %v1463_v47 = vrot.slane %v1462_v61, 1  ;;  %1857 = vmatpush3.bf16.msra.mxu1 %v2131_v31 }
 0x205   :  { %v1456_v51 = vrot.slane %v1455_v50, 1 }
 0x206   :  { %v1464_v54 = vadd.f32 %v1463_v47, %v1462_v61 }
 0x207   :  { %v1457_v46 = vadd.f32 %v1456_v51, %v1455_v50 }
 0x208   :  { %v1552_v55 = vpack.c.bf16 %v1464_v54, %v1464_v54 }
 0x209   :  { %v1551_v57 = vpack.c.bf16 %v1457_v46, %v1457_v46 }
 0x20a   :  { %v1607_v20 = vunpack.c.l.b16 %v1552_v55 }
 0x20b   :  { %v1606_v24 = vunpack.c.l.b16 %v1551_v57 }
 0x20d   :  { %v1623_v34 = vsel %vm1622_vm7, %v1606_v24, %v1621_v52 }
 0x20e   :  { %v2696_v28 = vsel %vm1624_vm8, %v1607_v20, %v1623_v34 }
 0x23f   :  { %v1820_v45 = vpop.f32.mrb[8].mxu0 }
 0x240   :  { %v1319_v49 = vadd.f32 %v1820_v45, %v2678_v59  ;;  %v1310_v0 = vpop.f32.mrb[9].mxu0 }
 0x241   :  { %v1311_v2 = vadd.f32 %v2678_v59, %v1310_v0  ;;  %v1821_v48 = vpop.f32.mrb[10].mxu0 }
 0x242   :  { %v1322_v3 = vadd.f32 %v1821_v48, %v2678_v59  ;;  %v1313_v39 = vpop.f32.mrb[11].mxu0  ;;  %v1415_v53 = vmax.f32 %v1319_v49, 0.0 }
 0x243   :  { %v1314_v58 = vadd.f32 %v2678_v59, %v1313_v39  ;;  %v1413_v16 = vmax.f32 %v1311_v2, 0.0 }
 0x244   :  { %v1416_v13 = vmax.f32 %v1322_v3, 0.0 }
 0x245   :  { %v1414_v42 = vmax.f32 %v1314_v58, 0.0 }
 0x246   :  { %v1472_v14 = vadd.f32 %v1416_v13, %v1415_v53 }
 0x247   :  { %v1465_v23 = vadd.f32 %v1414_v42, %v1413_v16  ;;  %v1824_v40 = vpop.f32.mrb[12].mxu0 }
 0x248   :  { %v1473_v18 = vrot.slane %v1472_v14, 4  ;;  %v1335_v32 = vadd.f32 %v1824_v40, %v2678_v59  ;;  %v1326_v19 = vpop.f32.mrb[13].mxu0 }
 0x249   :  { %v1466_v21 = vrot.slane %v1465_v23, 4  ;;  %v1327_v22 = vadd.f32 %v2678_v59, %v1326_v19  ;;  %v1825_v15 = vpop.f32.mrb[14].mxu0 }
 0x24a   :  { %v1474_v25 = vadd.f32 %v1473_v18, %v1472_v14  ;;  %v1338_v26 = vadd.f32 %v1825_v15, %v2678_v59  ;;  %v1329_v12 = vpop.f32.mrb[15].mxu0  ;;  %v1419_v38 = vmax.f32 %v1335_v32, 0.0 }
 0x24b   :  { %v1467_v7 = vadd.f32 %v1466_v21, %v1465_v23  ;;  %v1330_v27 = vadd.f32 %v2678_v59, %v1329_v12  ;;  %v1417_v35 = vmax.f32 %v1327_v22, 0.0 }
 0x24c   :  { %v1475_v36 = vrot.slane %v1474_v25, 2  ;;  %v1420_v9 = vmax.f32 %v1338_v26, 0.0 }
 0x24d   :  { %v1468_v33 = vrot.slane %v1467_v7, 2  ;;  %v1418_v8 = vmax.f32 %v1330_v27, 0.0 }
 0x24e   :  { %v1476_v30 = vadd.f32 %v1475_v36, %v1474_v25  ;;  %v1486_v41 = vadd.f32 %v1420_v9, %v1419_v38 }
 0x24f   :  { %v1469_v1 = vadd.f32 %v1468_v33, %v1467_v7  ;;  %v1479_v37 = vadd.f32 %v1418_v8, %v1417_v35  ;;  %v1828_v63 = vpop.f32.mrb[16].mxu0 }
 0x250   :  { %v1477_v44 = vrot.slane %v1476_v30, 1  ;;  %v1487_v6 = vrot.slane %v1486_v41, 4  ;;  %v1351_v29 = vadd.f32 %v1828_v63, %v2678_v59  ;;  %v1342_v62 = vpop.f32.mrb[17].mxu0 }
 0x251   :  { %v1470_v52 = vrot.slane %v1469_v1, 1  ;;  %v1480_v43 = vrot.slane %v1479_v37, 4  ;;  %v1343_v61 = vadd.f32 %v2678_v59, %v1342_v62  ;;  %v1829_v50 = vpop.f32.mrb[18].mxu0 }
 0x252   :  { %v1478_v5 = vadd.f32 %v1477_v44, %v1476_v30  ;;  %v1488_v47 = vadd.f32 %v1487_v6, %v1486_v41  ;;  %v1354_v51 = vadd.f32 %v1829_v50, %v2678_v59  ;;  %v1345_v54 = vpop.f32.mrb[19].mxu0  ;;  %v1423_v20 = vmax.f32 %v1351_v29, 0.0 }
 0x253   :  { %v1471_v46 = vadd.f32 %v1470_v52, %v1469_v1  ;;  %v1481_v55 = vadd.f32 %v1480_v43, %v1479_v37  ;;  %v1346_v57 = vadd.f32 %v2678_v59, %v1345_v54  ;;  %v1421_v11 = vmax.f32 %v1343_v61, 0.0 }
 0x254   :  { %v1489_v24 = vrot.slane %v1488_v47, 2  ;;  %v1424_v34 = vmax.f32 %v1354_v51, 0.0  ;;  %v1554_v60 = vpack.c.bf16 %v1478_v5, %v1478_v5 }
 0x255   :  { %v1553_v17 = vpack.c.bf16 %v1471_v46, %v1471_v46  ;;  %v1482_v56 = vrot.slane %v1481_v55, 2  ;;  %v1422_v45 = vmax.f32 %v1346_v57, 0.0 }
 0x256   :  { %v1490_v49 = vadd.f32 %v1489_v24, %v1488_v47  ;;  %v1500_v0 = vadd.f32 %v1424_v34, %v1423_v20  ;;  %v1609_v10 = vunpack.c.l.b16 %v1554_v60 }
 0x257   :  { %v1608_v2 = vunpack.c.l.b16 %v1553_v17  ;;  %v1483_v48 = vadd.f32 %v1482_v56, %v1481_v55  ;;  %v1493_v3 = vadd.f32 %v1422_v45, %v1421_v11  ;;  %v1832_v39 = vpop.f32.mrb[20].mxu0 }
 0x258   :  { %v1491_v58 = vrot.slane %v1490_v49, 1  ;;  %v1501_v4 = vrot.slane %v1500_v0, 4  ;;  %v1367_v53 = vadd.f32 %v1832_v39, %v2678_v59  ;;  %v1358_v13 = vpop.f32.mrb[21].mxu0 }
 0x259   :  { %v1484_v16 = vrot.slane %v1483_v48, 1  ;;  %v1494_v42 = vrot.slane %v1493_v3, 4  ;;  %v1359_v14 = vadd.f32 %v2678_v59, %v1358_v13  ;;  %v1833_v23 = vpop.f32.mrb[22].mxu0  ;;  %v1627_v40 = vsel %vm1626_vm10, %v1608_v2, %v2696_v28 }
 0x25a   :  { %v1492_v18 = vadd.f32 %v1491_v58, %v1490_v49  ;;  %v1502_v32 = vadd.f32 %v1501_v4, %v1500_v0  ;;  %v1370_v19 = vadd.f32 %v1833_v23, %v2678_v59  ;;  %v1361_v21 = vpop.f32.mrb[23].mxu0  ;;  %v1427_v12 = vmax.f32 %v1367_v53, 0.0 }
 0x25b   :  { %v1485_v22 = vadd.f32 %v1484_v16, %v1483_v48  ;;  %v1495_v15 = vadd.f32 %v1494_v42, %v1493_v3  ;;  %v1362_v25 = vadd.f32 %v2678_v59, %v1361_v21  ;;  %v1629_v27 = vsel %vm1628_vm11, %v1609_v10, %v1627_v40 }
 0x25c   :  { %v1503_v26 = vrot.slane %v1502_v32, 2  ;;  %v1428_v7 = vmax.f32 %v1370_v19, 0.0  ;;  %v1425_v38 = vmax.f32 %v1359_v14, 0.0  ;;  %v1556_v28 = vpack.c.bf16 %v1492_v18, %v1492_v18 }
 0x25d   :  { %v1555_v31 = vpack.c.bf16 %v1485_v22, %v1485_v22  ;;  %v1496_v36 = vrot.slane %v1495_v15, 2  ;;  %v1426_v9 = vmax.f32 %v1362_v25, 0.0 }
 0x25e   :  { %v1504_v33 = vadd.f32 %v1503_v26, %v1502_v32  ;;  %v1514_v35 = vadd.f32 %v1428_v7, %v1427_v12  ;;  %v1611_v54 = vunpack.c.l.b16 %v1556_v28 }
 0x25f   :  { %v1610_v8 = vunpack.c.l.b16 %v1555_v31  ;;  %v1497_v30 = vadd.f32 %v1496_v36, %v1495_v15  ;;  %v1507_v41 = vadd.f32 %v1426_v9, %v1425_v38  ;;  %v1836_v1 = vpop.f32.mrb[24].mxu0 }
 0x260   :  { %v1505_v37 = vrot.slane %v1504_v33, 1  ;;  %v1515_v63 = vrot.slane %v1514_v35, 4  ;;  %v1383_v44 = vadd.f32 %v1836_v1, %v2678_v59  ;;  %v1374_v6 = vpop.f32.mrb[25].mxu0 }
 0x261   :  { %v1498_v29 = vrot.slane %v1497_v30, 1  ;;  %v1508_v62 = vrot.slane %v1507_v41, 4  ;;  %v1375_v52 = vadd.f32 %v2678_v59, %v1374_v6  ;;  %v1837_v43 = vpop.f32.mrb[26].mxu0  ;;  %v1631_v61 = vsel %vm1630_vm12, %v1610_v8, %v1629_v27 }
 0x262   :  { %v1506_v50 = vadd.f32 %v1505_v37, %v1504_v33  ;;  %v1516_v5 = vadd.f32 %v1515_v63, %v1514_v35  ;;  %v1386_v47 = vadd.f32 %v1837_v43, %v2678_v59  ;;  %v1377_v51 = vpop.f32.mrb[27].mxu0  ;;  %v1431_v57 = vmax.f32 %v1383_v44, 0.0 }
 0x263   :  { %v1499_v46 = vadd.f32 %v1498_v29, %v1497_v30  ;;  %v1509_v55 = vadd.f32 %v1508_v62, %v1507_v41  ;;  %v1378_v24 = vadd.f32 %v2678_v59, %v1377_v51  ;;  %v2751_v56 = vsel %vm1632_vm13, %v1611_v54, %v1631_v61 }
 0x264   :  { %v1558_v20 = vpack.c.bf16 %v1506_v50, %v1506_v50  ;;  %v1517_v34 = vrot.slane %v1516_v5, 2  ;;  %v1432_v17 = vmax.f32 %v1386_v47, 0.0  ;;  %v1429_v60 = vmax.f32 %v1375_v52, 0.0 }
 0x265   :  { %v1557_v11 = vpack.c.bf16 %v1499_v46, %v1499_v46  ;;  %v1510_v45 = vrot.slane %v1509_v55, 2  ;;  %v1430_v49 = vmax.f32 %v1378_v24, 0.0 }
 0x266   :  { %v1613_v0 = vunpack.c.l.b16 %v1558_v20  ;;  %v1518_v2 = vadd.f32 %v1517_v34, %v1516_v5  ;;  %v1528_v48 = vadd.f32 %v1432_v17, %v1431_v57 }
 0x267   :  { %v1612_v3 = vunpack.c.l.b16 %v1557_v11  ;;  %v1511_v39 = vadd.f32 %v1510_v45, %v1509_v55  ;;  %v1521_v58 = vadd.f32 %v1430_v49, %v1429_v60 }
 0x268   :  { %v1519_v4 = vrot.slane %v1518_v2, 1  ;;  %v1529_v53 = vrot.slane %v1528_v48, 4 }
 0x269   :  { %v1634_v13 = vsel %vm1620_vm6, %v1613_v0, %v1612_v3  ;;  %v1512_v16 = vrot.slane %v1511_v39, 1  ;;  %v1522_v42 = vrot.slane %v1521_v58, 4 }
 0x26a   :  { %v1520_v14 = vadd.f32 %v1519_v4, %v1518_v2  ;;  %v1530_v23 = vadd.f32 %v1529_v53, %v1528_v48 }
 0x26b   :  { %v1513_v40 = vadd.f32 %v1512_v16, %v1511_v39  ;;  %v1523_v10 = vadd.f32 %v1522_v42, %v1521_v58  ;;  %v1764_v58 = vld [vmem:[%s2775_s4] ss:$0 sm:$0xff] }
 0x26c   :  { %v1560_v18 = vpack.c.bf16 %v1520_v14, %v1520_v14  ;;  %v1531_v32 = vrot.slane %v1530_v23, 2 }
 0x26d   :  { %v1559_v19 = vpack.c.bf16 %v1513_v40, %v1513_v40  ;;  %v1524_v21 = vrot.slane %v1523_v10, 2 }
 0x26e   :  { %v1532_v22 = vadd.f32 %v1531_v32, %v1530_v23  ;;  %v1615_v26 = vunpack.c.l.b16 %v1560_v18 }
 0x26f   :  { %v1614_v15 = vunpack.c.l.b16 %v1559_v19  ;;  %v1525_v25 = vadd.f32 %v1524_v21, %v1523_v10 }
 0x270   :  { %v1533_v12 = vrot.slane %v1532_v22, 1 }
 0x271   :  { %v1635_v7 = vsel %vm1622_vm7, %v1614_v15, %v1634_v13  ;;  %v1526_v27 = vrot.slane %v1525_v25, 1 }
 0x272   :  { %v1534_v31 = vadd.f32 %v1533_v12, %v1532_v22  ;;  %v1636_v36 = vsel %vm1624_vm8, %v1615_v26, %v1635_v7 }
 0x273   :  { %v1527_v38 = vadd.f32 %v1526_v27, %v1525_v25 }
 0x274   :  { %v1562_v9 = vpack.c.bf16 %v1534_v31, %v1534_v31 }
 0x275   :  { %v1561_v28 = vpack.c.bf16 %v1527_v38, %v1527_v38 }
 0x276   :  { %v1617_v35 = vunpack.c.l.b16 %v1562_v9 }
 0x277   :  { %v1616_v33 = vunpack.c.l.b16 %v1561_v28 }
 0x279   :  { %v1637_v8 = vsel %vm1626_vm10, %v1616_v33, %v1636_v36 }
 0x27a   :  { %v1638_v30 = vsel %vm1628_vm11, %v1617_v35, %v1637_v8 }
 0x2a6   :  { %v1840_v41 = vpop.f32.mrb[28].mxu0 }
 0x2a7   :  { %v1399_v1 = vadd.f32 %v1840_v41, %v2678_v59  ;;  %v1390_v37 = vpop.f32.mrb[29].mxu0 }
 0x2a8   :  { %v1391_v63 = vadd.f32 %v2678_v59, %v1390_v37  ;;  %v1841_v44 = vpop.f32.mrb[30].mxu0 }
 0x2a9   :  { %v1402_v6 = vadd.f32 %v1841_v44, %v2678_v59  ;;  %v1393_v29 = vpop.f32.mrb[31].mxu0  ;;  %v1435_v52 = vmax.f32 %v1399_v1, 0.0 }
 0x2aa   :  { %v1394_v62 = vadd.f32 %v2678_v59, %v1393_v29  ;;  %v1433_v61 = vmax.f32 %v1391_v63, 0.0 }
 0x2ab   :  { %v1436_v43 = vmax.f32 %v1402_v6, 0.0 }
 0x2ac   :  { %v1434_v50 = vmax.f32 %v1394_v62, 0.0 }
 0x2ad   :  { %v1542_v5 = vadd.f32 %v1436_v43, %v1435_v52 }
 0x2ae   :  { %v1535_v47 = vadd.f32 %v1434_v50, %v1433_v61 }
 0x2af   :  { %v1543_v51 = vrot.slane %v1542_v5, 4 }
 0x2b0   :  { %v1536_v54 = vrot.slane %v1535_v47, 4 }
 0x2b1   :  { %v1544_v46 = vadd.f32 %v1543_v51, %v1542_v5 }
 0x2b2   :  { %v1537_v55 = vadd.f32 %v1536_v54, %v1535_v47 }
 0x2b3   :  { %v1545_v57 = vrot.slane %v1544_v46, 2 }
 0x2b4   :  { %v1538_v24 = vrot.slane %v1537_v55, 2 }
 0x2b5   :  { %v1546_v20 = vadd.f32 %v1545_v57, %v1544_v46 }
 0x2b6   :  { %v1539_v34 = vadd.f32 %v1538_v24, %v1537_v55 }
 0x2b7   :  { %v1547_v17 = vrot.slane %v1546_v20, 1 }
 0x2b8   :  { %v1540_v11 = vrot.slane %v1539_v34, 1 }
 0x2b9   :  { %v1548_v45 = vadd.f32 %v1547_v17, %v1546_v20 }
 0x2ba   :  { %v1541_v60 = vadd.f32 %v1540_v11, %v1539_v34 }
 0x2bb   :  { %v1564_v49 = vpack.c.bf16 %v1548_v45, %v1548_v45 }
 0x2bc   :  { %v1563_v59 = vpack.c.bf16 %v1541_v60, %v1541_v60 }
 0x2bd   :  { %v1619_v2 = vunpack.c.l.b16 %v1564_v49 }
 0x2be   :  { %v1618_v0 = vunpack.c.l.b16 %v1563_v59 }
 0x2c0   :  { %v1639_v48 = vsel %vm1630_vm12, %v1618_v0, %v1638_v30 }
 0x2c1   :  { %v1640_v3 = vsel %vm1632_vm13, %v1619_v2, %v1639_v48 }
 0x2c2   :  { %v1641_v39 = vpack.c.b16 %v1640_v3, %v2751_v56 }
 0x2c4   :  { %1859 = vmatmul.mubr.bf16.vlgmr.msra.gmra.mrb[0].mxu1 %v1641_v39 }
 0x397   :  { %v1725_v4 = vpop.f32.mrb[0].mxu1 }
 0x398   :  { %v1860_v53 = vpop.f32.mrb[1].mxu1  ;;  %v1726_v16 = vadd.f32 %v1764_v58, %v1725_v4 }
 0x399   :  { %v1728_v13 = vpop.f32.mrb[2].mxu1 }
 0x39a   :  { %v1729_v42 = vadd.f32 %v1764_v58, %v1728_v13  ;;  %v1861_v14 = vpop.f32.mrb[3].mxu1 }
 0x39c   :  { %v1780_v23 = vpack.c.bf16 %v1729_v42, %v1726_v16 }
 0x39e   :  { %1781 = vst [vmem:[%s2776_s5] sm:$0xff] %v1780_v23  }

</bundles_post_ra>
